<compile_context>
chip_gen: v5e
topology: v5e:2x2
jax: 0.10.0
libtpu: 0.0.40
codegen_flags: <defaults>
</compile_context>

<pallas_src>
import functools
import math

import jax
import jax.numpy as jnp
from jax.experimental import pallas as pl
from jax.experimental.pallas import tpu as pltpu


PARAM_ORDER = [
    "wq", "bq", "wk", "bk", "wv", "bv",
    "qg", "qb", "kg", "kb",          # per-head LN gains/biases tiled to (1, E)
    "wu", "bu",
    "ln1_w", "ln1_b",
    "w1", "b1", "w2", "b2",
    "ln2_w", "ln2_b",
]


def _layernorm(z, w, b, eps=1e-5):
    mu = jnp.mean(z, axis=-1, keepdims=True)
    var = jnp.mean((z - mu) ** 2, axis=-1, keepdims=True)
    return (z - mu) * jax.lax.rsqrt(var + eps) * w + b


def contextual_transformer_kernel(
    x_ref, tok_ref, mask_ref, seg_ref, segt_ref, selh_ref,
    wq_ref, bq_ref, wk_ref, bk_ref, wv_ref, bv_ref,
    qg_ref, qb_ref, kg_ref, kb_ref,
    wu_ref, bu_ref,
    ln1_w_ref, ln1_b_ref,
    w1_ref, b1_ref, w2_ref, b2_ref,
    ln2_w_ref, ln2_b_ref,
    out_ref,
    *, num_heads, kqnorm, kqv_bias, compute_dtype,
):
    Bb, Tx, E = x_ref.shape            # block shapes (Tx, T multiples of 8 assumed)
    T = tok_ref.shape[1]
    H = num_heads
    Dh = E // H
    scale = 1.0 / (Dh ** 0.5)
    dt = compute_dtype

    def mm(a, b):                      # MXU matmul, f32 accumulation
        return jnp.dot(a.astype(dt), b.astype(dt),
                       preferred_element_type=jnp.float32)

    def bmm(eq, a, b):                 # batched einsum, f32 accumulation
        return jnp.einsum(eq, a.astype(dt), b.astype(dt),
                          preferred_element_type=jnp.float32)

    x3 = x_ref[...]                    # (Bb, Tx, E)
    tok3 = tok_ref[...]                # (Bb, T,  E)  (pre-concatenated in wrapper)
    xf = x3.reshape(Bb * Tx, E)        # leading-dim merges only
    tokf = tok3.reshape(Bb * T, E)

    q = mm(xf, wq_ref[...])            # (Bb*Tx, E)
    k = mm(tokf, wk_ref[...])          # (Bb*T,  E)
    v = mm(tokf, wv_ref[...])          # (Bb*T,  E)
    if kqv_bias:                       # statically skipped in the no-bias config
        q = q + bq_ref[...]
        k = k + bk_ref[...]
        v = v + bv_ref[...]

    if kqnorm:
        # Per-head LayerNorm without 4-wide lane slices: per-head sums and sums
        # of squares via a constant (E, H) 0/1 segment matrix on the MXU, then
        # broadcast mean/var back to E width with its transpose.
        seg = seg_ref[...]             # (E, H)
        segt = segt_ref[...]           # (H, E)
        inv_dh = 1.0 / Dh

        def head_layernorm(z, g, b, eps=1e-5):
            s1 = jnp.dot(z, seg, preferred_element_type=jnp.float32)        # (N, H)
            s2 = jnp.dot(z * z, seg, preferred_element_type=jnp.float32)    # (N, H)
            mu = s1 * inv_dh
            var = s2 * inv_dh - mu * mu
            mu_e = jnp.dot(mu, segt, preferred_element_type=jnp.float32)    # (N, E)
            var_e = jnp.dot(var, segt, preferred_element_type=jnp.float32)  # (N, E)
            return (z - mu_e) * jax.lax.rsqrt(var_e + eps) * g + b

        q = head_layernorm(q, qg_ref[...], qb_ref[...])
        k = head_layernorm(k, kg_ref[...], kb_ref[...])

    qn3 = q.reshape(Bb, Tx, E)
    kn3 = k.reshape(Bb, T, E)
    vn3 = v.reshape(Bb, T, E)

    # Multi-head attention without lane slicing / concatenation: replicate the
    # queries per head masked by the 0/1 head-selector rows, so each per-head
    # score is a full-E contraction of the masked query with k.
    selh = selh_ref[...]                                            # (H, 1, E)
    qm = (qn3[:, None, :, :] * selh[None, :, :, :]).reshape(Bb, H * Tx, E)

    scores = bmm("bqe,bke->bqk", qm, kn3) * scale                   # (Bb, H*Tx, T)
    # Additive key mask built in-kernel from the 1/0 mask; large *finite*
    # negative so fully-masked rows degrade to uniform attention (no NaN).
    scores = scores + (mask_ref[...] - 1.0) * 1e30                  # (Bb, 1, T) bcast

    m = jnp.max(scores, axis=-1, keepdims=True)
    p = jnp.exp(scores - m)
    p = p * pl.reciprocal(jnp.sum(p, axis=-1, keepdims=True), approx=True)

    ctx = bmm("bqk,bke->bqe", p, vn3)                               # (Bb, H*Tx, E)
    # Head h owns output columns h*Dh:(h+1)*Dh -> mask with the selector and
    # sum over heads to re-unify them (replaces the lane-axis concatenate).
    attn = jnp.sum(ctx.reshape(Bb, H, Tx, E) * selh[None, :, :, :], axis=1)
    attnf = attn.reshape(Bb * Tx, E)

    attended = mm(attnf, wu_ref[...]) + bu_ref[...]

    # residual -> layernorm -> MLP -> residual -> layernorm
    x1 = _layernorm(xf + attended, ln1_w_ref[...], ln1_b_ref[...])
    hdn = jnp.maximum(mm(x1, w1_ref[...]) + b1_ref[...], 0.0)
    tr = mm(hdn, w2_ref[...]) + b2_ref[...]
    y = _layernorm(x1 + tr, ln2_w_ref[...], ln2_b_ref[...])

    out_ref[...] = y.reshape(Bb, Tx, E)


def contextual_transformer(x, context, params, mask=None, context_mask=None,
                           *, num_heads=8, kqnorm=True, kqv_bias=False,
                           compute_dtype=jnp.float32, batch_block=8):
    B, Tx, E = x.shape
    _, Tc, _ = context.shape
    T = Tx + Tc
    H = num_heads
    Dh = E // H

    # Hoist the keys/values concatenation out of the kernel (one-time HBM op).
    tokens = jnp.concatenate([x, context], axis=1)                  # (B, T, E)

    # TODO(synk): masked *query* rows are not specially handled (key/value
    # masking only), matching the original port's behavior.
    if mask is None:
        mask = jnp.ones((B, Tx), dtype=jnp.float32)
    if context_mask is None:
        context_mask = jnp.ones((B, Tc), dtype=jnp.float32)
    kv_mask = jnp.concatenate([mask, context_mask], axis=1).astype(jnp.float32)
    kv_mask = kv_mask[:, None, :]                                   # (B, 1, T)

    # Constant head-segment matrices: seg[e, h] = 1 iff column e belongs to head h.
    seg = (jnp.arange(E)[:, None] // Dh == jnp.arange(H)[None, :]).astype(jnp.float32)
    segt = seg.T                                                    # (H, E)
    selh = segt[:, None, :]                                         # (H, 1, E)

    # Derived params: per-head LN gains/biases tiled to full width; matmul
    # weights pre-cast to the MXU compute dtype (bf16 path for v6e/v7x).
    derived = dict(params)
    derived["qg"] = jnp.tile(params["qln_w"], (1, H))
    derived["qb"] = jnp.tile(params["qln_b"], (1, H))
    derived["kg"] = jnp.tile(params["kln_w"], (1, H))
    derived["kb"] = jnp.tile(params["kln_b"], (1, H))
    for w in ("wq", "wk", "wv", "wu", "w1", "w2"):
        derived[w] = params[w].astype(compute_dtype)

    # Amortize per-grid-step overhead over a block of batches.
    Bb = math.gcd(B, batch_block)
    grid = (B // Bb,)

    def full_spec(arr):
        n = arr.ndim
        return pl.BlockSpec(arr.shape, lambda b, _n=n: (0,) * _n)

    in_specs = [
        pl.BlockSpec((Bb, Tx, E), lambda b: (b, 0, 0)),
        pl.BlockSpec((Bb, T, E), lambda b: (b, 0, 0)),
        pl.BlockSpec((Bb, 1, T), lambda b: (b, 0, 0)),
        full_spec(seg), full_spec(segt), full_spec(selh),
    ] + [full_spec(derived[name]) for name in PARAM_ORDER]

    kernel = functools.partial(
        contextual_transformer_kernel,
        num_heads=num_heads, kqnorm=kqnorm, kqv_bias=kqv_bias,
        compute_dtype=compute_dtype)

    return pl.pallas_call(
        kernel,
        grid=grid,
        in_specs=in_specs,
        out_specs=pl.BlockSpec((Bb, Tx, E), lambda b: (b, 0, 0)),
        out_shape=jax.ShapeDtypeStruct((B, Tx, E), jnp.float32),
        compiler_params=pltpu.CompilerParams(dimension_semantics=("parallel",)),
    )(x, tokens, kv_mask, seg, segt, selh,
      *[derived[name] for name in PARAM_ORDER])


def init_params(key, embedding_dim, num_heads, expansion=1,
                kqv_bias=False, mlp_bias=True):
    E, Dh, Eh = embedding_dim, embedding_dim // num_heads, embedding_dim * expansion
    ks = jax.random.split(key, 8)

    def lin_w(k, din, dout):
        s = 1.0 / (din ** 0.5)
        return jax.random.uniform(k, (din, dout), jnp.float32, -s, s)

    def lin_b(k, din, dout, use_bias):
        if not use_bias:
            return jnp.zeros((1, dout), jnp.float32)
        s = 1.0 / (din ** 0.5)
        return jax.random.uniform(k, (1, dout), jnp.float32, -s, s)

    kb = jax.random.split(ks[7], 6)
    return {
        "wq": lin_w(ks[0], E, E), "bq": lin_b(kb[0], E, E, kqv_bias),
        "wk": lin_w(ks[1], E, E), "bk": lin_b(kb[1], E, E, kqv_bias),
        "wv": lin_w(ks[2], E, E), "bv": lin_b(kb[2], E, E, kqv_bias),
        "qln_w": jnp.ones((1, Dh), jnp.float32), "qln_b": jnp.zeros((1, Dh), jnp.float32),
        "kln_w": jnp.ones((1, Dh), jnp.float32), "kln_b": jnp.zeros((1, Dh), jnp.float32),
        "wu": lin_w(ks[3], E, E), "bu": lin_b(kb[3], E, E, True),
        "ln1_w": jnp.ones((1, E), jnp.float32), "ln1_b": jnp.zeros((1, E), jnp.float32),
        "w1": lin_w(ks[4], E, Eh), "b1": lin_b(kb[4], E, Eh, mlp_bias),
        "w2": lin_w(ks[5], Eh, E), "b2": lin_b(kb[5], Eh, E, mlp_bias),
        "ln2_w": jnp.ones((1, E), jnp.float32), "ln2_b": jnp.zeros((1, E), jnp.float32),
    }


def reference(x, context, params, num_heads=8, kqnorm=True):
    """Pure-JAX reference mirroring the PyTorch forward semantics."""
    B, Tx, E = x.shape
    Dh = E // num_heads
    tokens = jnp.concatenate([x, context], axis=1)
    q = x @ params["wq"] + params["bq"]
    k = tokens @ params["wk"] + params["bk"]
    v = tokens @ params["wv"] + params["bv"]

    def split(z):
        return z.reshape(B, z.shape[1], num_heads, Dh).transpose(0, 2, 1, 3)

    qh, kh, vh = split(q), split(k), split(v)
    if kqnorm:
        qh = _layernorm(qh, params["qln_w"][0], params["qln_b"][0])
        kh = _layernorm(kh, params["kln_w"][0], params["kln_b"][0])
    scores = jnp.einsum("bhqd,bhkd->bhqk", qh, kh) / (Dh ** 0.5)
    p = jax.nn.softmax(scores, axis=-1)
    o = jnp.einsum("bhqk,bhkd->bhqd", p, vh).transpose(0, 2, 1, 3).reshape(B, Tx, E)
    attended = o @ params["wu"] + params["bu"]
    x1 = _layernorm(x + attended, params["ln1_w"][0], params["ln1_b"][0])
    tr = jnp.maximum(x1 @ params["w1"] + params["b1"], 0.0) @ params["w2"] + params["b2"]
    return _layernorm(x1 + tr, params["ln2_w"][0], params["ln2_b"][0])


if __name__ == "__main__":
    B, Tx, Tc, E, H = 2, 8, 8, 32, 8   # embedding_dim=32, num_heads=8, expansion=1

    key = jax.random.PRNGKey(0)
    kx, kc, kp = jax.random.split(key, 3)
    x = jax.random.normal(kx, (B, Tx, E), jnp.float32)
    context = jax.random.normal(kc, (B, Tc, E), jnp.float32)
    params = init_params(kp, E, H, expansion=1, kqv_bias=False, mlp_bias=True)

    out = contextual_transformer(x, context, params, num_heads=H, kqnorm=True)
    out = jax.block_until_ready(out)

    ref = reference(x, context, params, num_heads=H, kqnorm=True)
    assert out.shape == (B, Tx, E)
    assert bool(jnp.all(jnp.isfinite(out)))
    # Tolerance slightly looser than the exact-f32 reference because of the
    # approximate EUP reciprocal in the softmax normalization.
    assert bool(jnp.allclose(out, ref, atol=1e-2, rtol=1e-2)), "mismatch vs JAX reference"

    # bf16 MXU path (the relevant lever on v6e/v7x): same kernel, bf16 matmul
    # operands with f32 accumulation; loose check only.
    out_bf16 = contextual_transformer(x, context, params, num_heads=H, kqnorm=True,
                                      compute_dtype=jnp.bfloat16)
    out_bf16 = jax.block_until_ready(out_bf16)
    assert bool(jnp.all(jnp.isfinite(out_bf16)))
    assert float(jnp.max(jnp.abs(out_bf16 - ref))) < 0.5

    print("KERNEL_OK")
</pallas_src>

<mosaic_0001>
module attributes {stable_mosaic.version = 11 : i64} {
  func.func @contextual_transformer_kernel(%arg0: i32, %arg1: memref<2x8x32xf32, #tpu.memory_space<vmem>>, %arg2: memref<2x16x32xf32, #tpu.memory_space<vmem>>, %arg3: memref<2x1x16xf32, #tpu.memory_space<vmem>>, %arg4: memref<32x8xf32, #tpu.memory_space<vmem>>, %arg5: memref<8x32xf32, #tpu.memory_space<vmem>>, %arg6: memref<8x1x32xf32, #tpu.memory_space<vmem>>, %arg7: memref<32x32xf32, #tpu.memory_space<vmem>>, %arg8: memref<1x32xf32, #tpu.memory_space<vmem>>, %arg9: memref<32x32xf32, #tpu.memory_space<vmem>>, %arg10: memref<1x32xf32, #tpu.memory_space<vmem>>, %arg11: memref<32x32xf32, #tpu.memory_space<vmem>>, %arg12: memref<1x32xf32, #tpu.memory_space<vmem>>, %arg13: memref<1x32xf32, #tpu.memory_space<vmem>>, %arg14: memref<1x32xf32, #tpu.memory_space<vmem>>, %arg15: memref<1x32xf32, #tpu.memory_space<vmem>>, %arg16: memref<1x32xf32, #tpu.memory_space<vmem>>, %arg17: memref<32x32xf32, #tpu.memory_space<vmem>>, %arg18: memref<1x32xf32, #tpu.memory_space<vmem>>, %arg19: memref<1x32xf32, #tpu.memory_space<vmem>>, %arg20: memref<1x32xf32, #tpu.memory_space<vmem>>, %arg21: memref<32x32xf32, #tpu.memory_space<vmem>>, %arg22: memref<1x32xf32, #tpu.memory_space<vmem>>, %arg23: memref<32x32xf32, #tpu.memory_space<vmem>>, %arg24: memref<1x32xf32, #tpu.memory_space<vmem>>, %arg25: memref<1x32xf32, #tpu.memory_space<vmem>>, %arg26: memref<1x32xf32, #tpu.memory_space<vmem>>, %arg27: memref<2x8x32xf32, #tpu.memory_space<vmem>>) attributes {dimension_semantics = [#tpu.dimension_semantics<parallel>], iteration_bounds = array<i64: 1>, scalar_prefetch = 0 : i64, scratch_operands = 0 : i64, tpu.core_type = #tpu.core_type<tc>, window_params = [{transform_indices = @transform_0, window_bounds = array<i64: 2, 8, 32>}, {transform_indices = @transform_1, window_bounds = array<i64: 2, 16, 32>}, {transform_indices = @transform_2, window_bounds = array<i64: 2, 1, 16>}, {pipeline_mode = #tpu.pipeline_mode<synchronous>, transform_indices = @transform_3, window_bounds = array<i64: 32, 8>}, {pipeline_mode = #tpu.pipeline_mode<synchronous>, transform_indices = @transform_4, window_bounds = array<i64: 8, 32>}, {pipeline_mode = #tpu.pipeline_mode<synchronous>, transform_indices = @transform_5, window_bounds = array<i64: 8, 1, 32>}, {pipeline_mode = #tpu.pipeline_mode<synchronous>, transform_indices = @transform_6, window_bounds = array<i64: 32, 32>}, {pipeline_mode = #tpu.pipeline_mode<synchronous>, transform_indices = @transform_7, window_bounds = array<i64: 1, 32>}, {pipeline_mode = #tpu.pipeline_mode<synchronous>, transform_indices = @transform_8, window_bounds = array<i64: 32, 32>}, {pipeline_mode = #tpu.pipeline_mode<synchronous>, transform_indices = @transform_9, window_bounds = array<i64: 1, 32>}, {pipeline_mode = #tpu.pipeline_mode<synchronous>, transform_indices = @transform_10, window_bounds = array<i64: 32, 32>}, {pipeline_mode = #tpu.pipeline_mode<synchronous>, transform_indices = @transform_11, window_bounds = array<i64: 1, 32>}, {pipeline_mode = #tpu.pipeline_mode<synchronous>, transform_indices = @transform_12, window_bounds = array<i64: 1, 32>}, {pipeline_mode = #tpu.pipeline_mode<synchronous>, transform_indices = @transform_13, window_bounds = array<i64: 1, 32>}, {pipeline_mode = #tpu.pipeline_mode<synchronous>, transform_indices = @transform_14, window_bounds = array<i64: 1, 32>}, {pipeline_mode = #tpu.pipeline_mode<synchronous>, transform_indices = @transform_15, window_bounds = array<i64: 1, 32>}, {pipeline_mode = #tpu.pipeline_mode<synchronous>, transform_indices = @transform_16, window_bounds = array<i64: 32, 32>}, {pipeline_mode = #tpu.pipeline_mode<synchronous>, transform_indices = @transform_17, window_bounds = array<i64: 1, 32>}, {pipeline_mode = #tpu.pipeline_mode<synchronous>, transform_indices = @transform_18, window_bounds = array<i64: 1, 32>}, {pipeline_mode = #tpu.pipeline_mode<synchronous>, transform_indices = @transform_19, window_bounds = array<i64: 1, 32>}, {pipeline_mode = #tpu.pipeline_mode<synchronous>, transform_indices = @transform_20, window_bounds = array<i64: 32, 32>}, {pipeline_mode = #tpu.pipeline_mode<synchronous>, transform_indices = @transform_21, window_bounds = array<i64: 1, 32>}, {pipeline_mode = #tpu.pipeline_mode<synchronous>, transform_indices = @transform_22, window_bounds = array<i64: 32, 32>}, {pipeline_mode = #tpu.pipeline_mode<synchronous>, transform_indices = @transform_23, window_bounds = array<i64: 1, 32>}, {pipeline_mode = #tpu.pipeline_mode<synchronous>, transform_indices = @transform_24, window_bounds = array<i64: 1, 32>}, {pipeline_mode = #tpu.pipeline_mode<synchronous>, transform_indices = @transform_25, window_bounds = array<i64: 1, 32>}, {transform_indices = @transform_26, window_bounds = array<i64: 2, 8, 32>}]} {
    %c0 = arith.constant 0 : index
    %c0_0 = arith.constant 0 : index
    %c0_1 = arith.constant 0 : index
    %0 = vector.load %arg1[%c0, %c0_0, %c0_1] : memref<2x8x32xf32, #tpu.memory_space<vmem>>, vector<2x8x32xf32>
    %c0_2 = arith.constant 0 : index
    %c0_3 = arith.constant 0 : index
    %c0_4 = arith.constant 0 : index
    %1 = vector.load %arg2[%c0_2, %c0_3, %c0_4] : memref<2x16x32xf32, #tpu.memory_space<vmem>>, vector<2x16x32xf32>
    %2 = vector.shape_cast %0 : vector<2x8x32xf32> to vector<16x32xf32>
    %3 = vector.shape_cast %1 : vector<2x16x32xf32> to vector<32x32xf32>
    %c0_5 = arith.constant 0 : index
    %c0_6 = arith.constant 0 : index
    %4 = vector.load %arg7[%c0_5, %c0_6] : memref<32x32xf32, #tpu.memory_space<vmem>>, vector<32x32xf32>
    %cst = arith.constant dense<0.000000e+00> : vector<16x32xf32>
    %5 = tpu.matmul %2, %4, %cst {dimension_numbers = #tpu.dot_dimension_numbers<[1], [0], [0], [1], [0, 0, 1, 1], [], []>} : vector<16x32xf32>, vector<32x32xf32>, vector<16x32xf32> -> vector<16x32xf32>
    %c0_7 = arith.constant 0 : index
    %c0_8 = arith.constant 0 : index
    %6 = vector.load %arg9[%c0_7, %c0_8] : memref<32x32xf32, #tpu.memory_space<vmem>>, vector<32x32xf32>
    %cst_9 = arith.constant dense<0.000000e+00> : vector<32x32xf32>
    %7 = tpu.matmul %3, %6, %cst_9 {dimension_numbers = #tpu.dot_dimension_numbers<[1], [0], [0], [1], [0, 0, 1, 1], [], []>} : vector<32x32xf32>, vector<32x32xf32>, vector<32x32xf32> -> vector<32x32xf32>
    %c0_10 = arith.constant 0 : index
    %c0_11 = arith.constant 0 : index
    %8 = vector.load %arg11[%c0_10, %c0_11] : memref<32x32xf32, #tpu.memory_space<vmem>>, vector<32x32xf32>
    %cst_12 = arith.constant dense<0.000000e+00> : vector<32x32xf32>
    %9 = tpu.matmul %3, %8, %cst_12 {dimension_numbers = #tpu.dot_dimension_numbers<[1], [0], [0], [1], [0, 0, 1, 1], [], []>} : vector<32x32xf32>, vector<32x32xf32>, vector<32x32xf32> -> vector<32x32xf32>
    %c0_13 = arith.constant 0 : index
    %c0_14 = arith.constant 0 : index
    %10 = vector.load %arg4[%c0_13, %c0_14] : memref<32x8xf32, #tpu.memory_space<vmem>>, vector<32x8xf32>
    %c0_15 = arith.constant 0 : index
    %c0_16 = arith.constant 0 : index
    %11 = vector.load %arg5[%c0_15, %c0_16] : memref<8x32xf32, #tpu.memory_space<vmem>>, vector<8x32xf32>
    %c0_17 = arith.constant 0 : index
    %c0_18 = arith.constant 0 : index
    %12 = vector.load %arg13[%c0_17, %c0_18] : memref<1x32xf32, #tpu.memory_space<vmem>>, vector<1x32xf32>
    %c0_19 = arith.constant 0 : index
    %c0_20 = arith.constant 0 : index
    %13 = vector.load %arg14[%c0_19, %c0_20] : memref<1x32xf32, #tpu.memory_space<vmem>>, vector<1x32xf32>
    %cst_21 = arith.constant dense<0.000000e+00> : vector<16x8xf32>
    %14 = tpu.matmul %5, %10, %cst_21 {dimension_numbers = #tpu.dot_dimension_numbers<[1], [0], [0], [1], [0, 0, 1, 1], [], []>} : vector<16x32xf32>, vector<32x8xf32>, vector<16x8xf32> -> vector<16x8xf32>
    %15 = arith.mulf %5, %5 : vector<16x32xf32>
    %cst_22 = arith.constant dense<0.000000e+00> : vector<16x8xf32>
    %16 = tpu.matmul %15, %10, %cst_22 {dimension_numbers = #tpu.dot_dimension_numbers<[1], [0], [0], [1], [0, 0, 1, 1], [], []>} : vector<16x32xf32>, vector<32x8xf32>, vector<16x8xf32> -> vector<16x8xf32>
    %cst_23 = arith.constant 2.500000e-01 : f32
    %17 = vector.broadcast %cst_23 : f32 to vector<16x8xf32>
    %18 = arith.mulf %14, %17 : vector<16x8xf32>
    %cst_24 = arith.constant 2.500000e-01 : f32
    %19 = vector.broadcast %cst_24 : f32 to vector<16x8xf32>
    %20 = arith.mulf %16, %19 : vector<16x8xf32>
    %21 = arith.mulf %18, %18 : vector<16x8xf32>
    %22 = arith.subf %20, %21 : vector<16x8xf32>
    %cst_25 = arith.constant dense<0.000000e+00> : vector<16x32xf32>
    %23 = tpu.matmul %18, %11, %cst_25 {dimension_numbers = #tpu.dot_dimension_numbers<[1], [0], [0], [1], [0, 0, 1, 1], [], []>} : vector<16x8xf32>, vector<8x32xf32>, vector<16x32xf32> -> vector<16x32xf32>
    %cst_26 = arith.constant dense<0.000000e+00> : vector<16x32xf32>
    %24 = tpu.matmul %22, %11, %cst_26 {dimension_numbers = #tpu.dot_dimension_numbers<[1], [0], [0], [1], [0, 0, 1, 1], [], []>} : vector<16x8xf32>, vector<8x32xf32>, vector<16x32xf32> -> vector<16x32xf32>
    %25 = arith.subf %5, %23 : vector<16x32xf32>
    %cst_27 = arith.constant 9.99999974E-6 : f32
    %26 = vector.broadcast %cst_27 : f32 to vector<16x32xf32>
    %27 = arith.addf %24, %26 : vector<16x32xf32>
    %28 = math.rsqrt %27 : vector<16x32xf32>
    %29 = arith.mulf %25, %28 : vector<16x32xf32>
    %30 = vector.broadcast %12 : vector<1x32xf32> to vector<16x32xf32>
    %31 = arith.mulf %29, %30 : vector<16x32xf32>
    %32 = vector.broadcast %13 : vector<1x32xf32> to vector<16x32xf32>
    %33 = arith.addf %31, %32 : vector<16x32xf32>
    %c0_28 = arith.constant 0 : index
    %c0_29 = arith.constant 0 : index
    %34 = vector.load %arg15[%c0_28, %c0_29] : memref<1x32xf32, #tpu.memory_space<vmem>>, vector<1x32xf32>
    %c0_30 = arith.constant 0 : index
    %c0_31 = arith.constant 0 : index
    %35 = vector.load %arg16[%c0_30, %c0_31] : memref<1x32xf32, #tpu.memory_space<vmem>>, vector<1x32xf32>
    %cst_32 = arith.constant dense<0.000000e+00> : vector<32x8xf32>
    %36 = tpu.matmul %7, %10, %cst_32 {dimension_numbers = #tpu.dot_dimension_numbers<[1], [0], [0], [1], [0, 0, 1, 1], [], []>} : vector<32x32xf32>, vector<32x8xf32>, vector<32x8xf32> -> vector<32x8xf32>
    %37 = arith.mulf %7, %7 : vector<32x32xf32>
    %cst_33 = arith.constant dense<0.000000e+00> : vector<32x8xf32>
    %38 = tpu.matmul %37, %10, %cst_33 {dimension_numbers = #tpu.dot_dimension_numbers<[1], [0], [0], [1], [0, 0, 1, 1], [], []>} : vector<32x32xf32>, vector<32x8xf32>, vector<32x8xf32> -> vector<32x8xf32>
    %cst_34 = arith.constant 2.500000e-01 : f32
    %39 = vector.broadcast %cst_34 : f32 to vector<32x8xf32>
    %40 = arith.mulf %36, %39 : vector<32x8xf32>
    %cst_35 = arith.constant 2.500000e-01 : f32
    %41 = vector.broadcast %cst_35 : f32 to vector<32x8xf32>
    %42 = arith.mulf %38, %41 : vector<32x8xf32>
    %43 = arith.mulf %40, %40 : vector<32x8xf32>
    %44 = arith.subf %42, %43 : vector<32x8xf32>
    %cst_36 = arith.constant dense<0.000000e+00> : vector<32x32xf32>
    %45 = tpu.matmul %40, %11, %cst_36 {dimension_numbers = #tpu.dot_dimension_numbers<[1], [0], [0], [1], [0, 0, 1, 1], [], []>} : vector<32x8xf32>, vector<8x32xf32>, vector<32x32xf32> -> vector<32x32xf32>
    %cst_37 = arith.constant dense<0.000000e+00> : vector<32x32xf32>
    %46 = tpu.matmul %44, %11, %cst_37 {dimension_numbers = #tpu.dot_dimension_numbers<[1], [0], [0], [1], [0, 0, 1, 1], [], []>} : vector<32x8xf32>, vector<8x32xf32>, vector<32x32xf32> -> vector<32x32xf32>
    %47 = arith.subf %7, %45 : vector<32x32xf32>
    %cst_38 = arith.constant 9.99999974E-6 : f32
    %48 = vector.broadcast %cst_38 : f32 to vector<32x32xf32>
    %49 = arith.addf %46, %48 : vector<32x32xf32>
    %50 = math.rsqrt %49 : vector<32x32xf32>
    %51 = arith.mulf %47, %50 : vector<32x32xf32>
    %52 = vector.broadcast %34 : vector<1x32xf32> to vector<32x32xf32>
    %53 = arith.mulf %51, %52 : vector<32x32xf32>
    %54 = vector.broadcast %35 : vector<1x32xf32> to vector<32x32xf32>
    %55 = arith.addf %53, %54 : vector<32x32xf32>
    %56 = vector.shape_cast %33 : vector<16x32xf32> to vector<2x8x32xf32>
    %57 = vector.shape_cast %55 : vector<32x32xf32> to vector<2x16x32xf32>
    %58 = vector.shape_cast %9 : vector<32x32xf32> to vector<2x16x32xf32>
    %c0_39 = arith.constant 0 : index
    %c0_40 = arith.constant 0 : index
    %c0_41 = arith.constant 0 : index
    %59 = vector.load %arg6[%c0_39, %c0_40, %c0_41] : memref<8x1x32xf32, #tpu.memory_space<vmem>>, vector<8x1x32xf32>
    %60 = vector.shape_cast %56 : vector<2x8x32xf32> to vector<2x1x8x32xf32>
    %61 = vector.shape_cast %59 : vector<8x1x32xf32> to vector<1x8x1x32xf32>
    %62 = vector.broadcast %60 : vector<2x1x8x32xf32> to vector<2x8x8x32xf32>
    %63 = vector.broadcast %61 : vector<1x8x1x32xf32> to vector<2x8x8x32xf32>
    %64 = arith.mulf %62, %63 : vector<2x8x8x32xf32>
    %65 = vector.shape_cast %64 : vector<2x8x8x32xf32> to vector<2x64x32xf32>
    "tpu.trace_start"() <{level = 10 : i32, message = "bqe,bke->bqk"}> : () -> ()
    %cst_42 = arith.constant dense<0.000000e+00> : vector<2x64x16xf32>
    %66 = tpu.matmul %65, %57, %cst_42 {dimension_numbers = #tpu.dot_dimension_numbers<[2], [2], [1], [1], [0, 0, 0, 1, 1, 1], [0], [0]>} : vector<2x64x32xf32>, vector<2x16x32xf32>, vector<2x64x16xf32> -> vector<2x64x16xf32>
    "tpu.trace_stop"() : () -> ()
    %cst_43 = arith.constant 5.000000e-01 : f32
    %67 = vector.broadcast %cst_43 : f32 to vector<2x64x16xf32>
    %68 = arith.mulf %66, %67 : vector<2x64x16xf32>
    %c0_44 = arith.constant 0 : index
    %c0_45 = arith.constant 0 : index
    %c0_46 = arith.constant 0 : index
    %69 = vector.load %arg3[%c0_44, %c0_45, %c0_46] : memref<2x1x16xf32, #tpu.memory_space<vmem>>, vector<2x1x16xf32>
    %cst_47 = arith.constant 1.000000e+00 : f32
    %70 = vector.broadcast %cst_47 : f32 to vector<2x1x16xf32>
    %71 = arith.subf %69, %70 : vector<2x1x16xf32>
    %cst_48 = arith.constant 1.000000e+30 : f32
    %72 = vector.broadcast %cst_48 : f32 to vector<2x1x16xf32>
    %73 = arith.mulf %71, %72 : vector<2x1x16xf32>
    %74 = vector.broadcast %73 : vector<2x1x16xf32> to vector<2x64x16xf32>
    %75 = arith.addf %68, %74 : vector<2x64x16xf32>
    %cst_49 = arith.constant dense<0xFF800000> : vector<2x64xf32>
    %76 = vector.multi_reduction <maximumf>, %75, %cst_49 [2] : vector<2x64x16xf32> to vector<2x64xf32>
    %77 = vector.shape_cast %76 : vector<2x64xf32> to vector<2x64x1xf32>
    %78 = vector.broadcast %77 : vector<2x64x1xf32> to vector<2x64x16xf32>
    %79 = arith.subf %75, %78 : vector<2x64x16xf32>
    %80 = math.exp %79 : vector<2x64x16xf32>
    %cst_50 = arith.constant dense<0.000000e+00> : vector<2x64xf32>
    %81 = vector.multi_reduction <add>, %80, %cst_50 [2] : vector<2x64x16xf32> to vector<2x64xf32>
    %82 = vector.shape_cast %81 : vector<2x64xf32> to vector<2x64x1xf32>
    %83 = tpu.reciprocal %82 {approx = true} : vector<2x64x1xf32> -> vector<2x64x1xf32>
    %84 = vector.broadcast %83 : vector<2x64x1xf32> to vector<2x64x16xf32>
    %85 = arith.mulf %80, %84 : vector<2x64x16xf32>
    "tpu.trace_start"() <{level = 10 : i32, message = "bqk,bke->bqe"}> : () -> ()
    %cst_51 = arith.constant dense<0.000000e+00> : vector<2x64x32xf32>
    %86 = tpu.matmul %85, %58, %cst_51 {dimension_numbers = #tpu.dot_dimension_numbers<[2], [1], [1], [2], [0, 0, 0, 1, 1, 2], [0], [0]>} : vector<2x64x16xf32>, vector<2x16x32xf32>, vector<2x64x32xf32> -> vector<2x64x32xf32>
    "tpu.trace_stop"() : () -> ()
    %87 = vector.shape_cast %86 : vector<2x64x32xf32> to vector<2x8x8x32xf32>
    %88 = vector.shape_cast %59 : vector<8x1x32xf32> to vector<1x8x1x32xf32>
    %89 = vector.broadcast %88 : vector<1x8x1x32xf32> to vector<2x8x8x32xf32>
    %90 = arith.mulf %87, %89 : vector<2x8x8x32xf32>
    %cst_52 = arith.constant dense<0.000000e+00> : vector<2x8x32xf32>
    %91 = vector.multi_reduction <add>, %90, %cst_52 [1] : vector<2x8x8x32xf32> to vector<2x8x32xf32>
    %92 = vector.shape_cast %91 : vector<2x8x32xf32> to vector<16x32xf32>
    %c0_53 = arith.constant 0 : index
    %c0_54 = arith.constant 0 : index
    %93 = vector.load %arg17[%c0_53, %c0_54] : memref<32x32xf32, #tpu.memory_space<vmem>>, vector<32x32xf32>
    %cst_55 = arith.constant dense<0.000000e+00> : vector<16x32xf32>
    %94 = tpu.matmul %92, %93, %cst_55 {dimension_numbers = #tpu.dot_dimension_numbers<[1], [0], [0], [1], [0, 0, 1, 1], [], []>} : vector<16x32xf32>, vector<32x32xf32>, vector<16x32xf32> -> vector<16x32xf32>
    %c0_56 = arith.constant 0 : index
    %c0_57 = arith.constant 0 : index
    %95 = vector.load %arg18[%c0_56, %c0_57] : memref<1x32xf32, #tpu.memory_space<vmem>>, vector<1x32xf32>
    %96 = vector.broadcast %95 : vector<1x32xf32> to vector<16x32xf32>
    %97 = arith.addf %94, %96 : vector<16x32xf32>
    %98 = arith.addf %2, %97 : vector<16x32xf32>
    %c0_58 = arith.constant 0 : index
    %c0_59 = arith.constant 0 : index
    %99 = vector.load %arg19[%c0_58, %c0_59] : memref<1x32xf32, #tpu.memory_space<vmem>>, vector<1x32xf32>
    %c0_60 = arith.constant 0 : index
    %c0_61 = arith.constant 0 : index
    %100 = vector.load %arg20[%c0_60, %c0_61] : memref<1x32xf32, #tpu.memory_space<vmem>>, vector<1x32xf32>
    %cst_62 = arith.constant dense<0.000000e+00> : vector<16xf32>
    %101 = vector.multi_reduction <add>, %98, %cst_62 [1] : vector<16x32xf32> to vector<16xf32>
    %102 = vector.shape_cast %101 : vector<16xf32> to vector<16x1xf32>
    %cst_63 = arith.constant 3.200000e+01 : f32
    %103 = vector.broadcast %cst_63 : f32 to vector<16x1xf32>
    %104 = arith.divf %102, %103 : vector<16x1xf32>
    %105 = vector.broadcast %104 : vector<16x1xf32> to vector<16x32xf32>
    %106 = arith.subf %98, %105 : vector<16x32xf32>
    %107 = arith.mulf %106, %106 : vector<16x32xf32>
    %cst_64 = arith.constant dense<0.000000e+00> : vector<16xf32>
    %108 = vector.multi_reduction <add>, %107, %cst_64 [1] : vector<16x32xf32> to vector<16xf32>
    %109 = vector.shape_cast %108 : vector<16xf32> to vector<16x1xf32>
    %cst_65 = arith.constant 3.200000e+01 : f32
    %110 = vector.broadcast %cst_65 : f32 to vector<16x1xf32>
    %111 = arith.divf %109, %110 : vector<16x1xf32>
    %112 = vector.broadcast %104 : vector<16x1xf32> to vector<16x32xf32>
    %113 = arith.subf %98, %112 : vector<16x32xf32>
    %cst_66 = arith.constant 9.99999974E-6 : f32
    %114 = vector.broadcast %cst_66 : f32 to vector<16x1xf32>
    %115 = arith.addf %111, %114 : vector<16x1xf32>
    %116 = math.rsqrt %115 : vector<16x1xf32>
    %117 = vector.broadcast %116 : vector<16x1xf32> to vector<16x32xf32>
    %118 = arith.mulf %113, %117 : vector<16x32xf32>
    %119 = vector.broadcast %99 : vector<1x32xf32> to vector<16x32xf32>
    %120 = arith.mulf %118, %119 : vector<16x32xf32>
    %121 = vector.broadcast %100 : vector<1x32xf32> to vector<16x32xf32>
    %122 = arith.addf %120, %121 : vector<16x32xf32>
    %c0_67 = arith.constant 0 : index
    %c0_68 = arith.constant 0 : index
    %123 = vector.load %arg21[%c0_67, %c0_68] : memref<32x32xf32, #tpu.memory_space<vmem>>, vector<32x32xf32>
    %cst_69 = arith.constant dense<0.000000e+00> : vector<16x32xf32>
    %124 = tpu.matmul %122, %123, %cst_69 {dimension_numbers = #tpu.dot_dimension_numbers<[1], [0], [0], [1], [0, 0, 1, 1], [], []>} : vector<16x32xf32>, vector<32x32xf32>, vector<16x32xf32> -> vector<16x32xf32>
    %c0_70 = arith.constant 0 : index
    %c0_71 = arith.constant 0 : index
    %125 = vector.load %arg22[%c0_70, %c0_71] : memref<1x32xf32, #tpu.memory_space<vmem>>, vector<1x32xf32>
    %126 = vector.broadcast %125 : vector<1x32xf32> to vector<16x32xf32>
    %127 = arith.addf %124, %126 : vector<16x32xf32>
    %cst_72 = arith.constant 0.000000e+00 : f32
    %128 = vector.broadcast %cst_72 : f32 to vector<16x32xf32>
    %129 = arith.maximumf %127, %128 : vector<16x32xf32>
    %c0_73 = arith.constant 0 : index
    %c0_74 = arith.constant 0 : index
    %130 = vector.load %arg23[%c0_73, %c0_74] : memref<32x32xf32, #tpu.memory_space<vmem>>, vector<32x32xf32>
    %cst_75 = arith.constant dense<0.000000e+00> : vector<16x32xf32>
    %131 = tpu.matmul %129, %130, %cst_75 {dimension_numbers = #tpu.dot_dimension_numbers<[1], [0], [0], [1], [0, 0, 1, 1], [], []>} : vector<16x32xf32>, vector<32x32xf32>, vector<16x32xf32> -> vector<16x32xf32>
    %c0_76 = arith.constant 0 : index
    %c0_77 = arith.constant 0 : index
    %132 = vector.load %arg24[%c0_76, %c0_77] : memref<1x32xf32, #tpu.memory_space<vmem>>, vector<1x32xf32>
    %133 = vector.broadcast %132 : vector<1x32xf32> to vector<16x32xf32>
    %134 = arith.addf %131, %133 : vector<16x32xf32>
    %135 = arith.addf %122, %134 : vector<16x32xf32>
    %c0_78 = arith.constant 0 : index
    %c0_79 = arith.constant 0 : index
    %136 = vector.load %arg25[%c0_78, %c0_79] : memref<1x32xf32, #tpu.memory_space<vmem>>, vector<1x32xf32>
    %c0_80 = arith.constant 0 : index
    %c0_81 = arith.constant 0 : index
    %137 = vector.load %arg26[%c0_80, %c0_81] : memref<1x32xf32, #tpu.memory_space<vmem>>, vector<1x32xf32>
    %cst_82 = arith.constant dense<0.000000e+00> : vector<16xf32>
    %138 = vector.multi_reduction <add>, %135, %cst_82 [1] : vector<16x32xf32> to vector<16xf32>
    %139 = vector.shape_cast %138 : vector<16xf32> to vector<16x1xf32>
    %cst_83 = arith.constant 3.200000e+01 : f32
    %140 = vector.broadcast %cst_83 : f32 to vector<16x1xf32>
    %141 = arith.divf %139, %140 : vector<16x1xf32>
    %142 = vector.broadcast %141 : vector<16x1xf32> to vector<16x32xf32>
    %143 = arith.subf %135, %142 : vector<16x32xf32>
    %144 = arith.mulf %143, %143 : vector<16x32xf32>
    %cst_84 = arith.constant dense<0.000000e+00> : vector<16xf32>
    %145 = vector.multi_reduction <add>, %144, %cst_84 [1] : vector<16x32xf32> to vector<16xf32>
    %146 = vector.shape_cast %145 : vector<16xf32> to vector<16x1xf32>
    %cst_85 = arith.constant 3.200000e+01 : f32
    %147 = vector.broadcast %cst_85 : f32 to vector<16x1xf32>
    %148 = arith.divf %146, %147 : vector<16x1xf32>
    %149 = vector.broadcast %141 : vector<16x1xf32> to vector<16x32xf32>
    %150 = arith.subf %135, %149 : vector<16x32xf32>
    %cst_86 = arith.constant 9.99999974E-6 : f32
    %151 = vector.broadcast %cst_86 : f32 to vector<16x1xf32>
    %152 = arith.addf %148, %151 : vector<16x1xf32>
    %153 = math.rsqrt %152 : vector<16x1xf32>
    %154 = vector.broadcast %153 : vector<16x1xf32> to vector<16x32xf32>
    %155 = arith.mulf %150, %154 : vector<16x32xf32>
    %156 = vector.broadcast %136 : vector<1x32xf32> to vector<16x32xf32>
    %157 = arith.mulf %155, %156 : vector<16x32xf32>
    %158 = vector.broadcast %137 : vector<1x32xf32> to vector<16x32xf32>
    %159 = arith.addf %157, %158 : vector<16x32xf32>
    %160 = vector.shape_cast %159 : vector<16x32xf32> to vector<2x8x32xf32>
    %c0_87 = arith.constant 0 : index
    %c0_88 = arith.constant 0 : index
    %c0_89 = arith.constant 0 : index
    %161 = vector.load %arg27[%c0_87, %c0_88, %c0_89] : memref<2x8x32xf32, #tpu.memory_space<vmem>>, vector<2x8x32xf32>
    tpu.vector_store %arg27[%c0_87, %c0_88, %c0_89], %160 {strides = array<i32>} : memref<2x8x32xf32, #tpu.memory_space<vmem>>, vector<2x8x32xf32>,
    return
  }
  func.func @transform_0(%arg0: i32) -> (i32, i32, i32) {
    %c0_i32 = arith.constant 0 : i32
    %c0_i32_0 = arith.constant 0 : i32
    %c0_i32_1 = arith.constant 0 : i32
    return %arg0, %c0_i32, %c0_i32_0 : i32, i32, i32
  }
  func.func @transform_1(%arg0: i32) -> (i32, i32, i32) {
    %c0_i32 = arith.constant 0 : i32
    %c0_i32_0 = arith.constant 0 : i32
    %c0_i32_1 = arith.constant 0 : i32
    return %arg0, %c0_i32, %c0_i32_0 : i32, i32, i32
  }
  func.func @transform_2(%arg0: i32) -> (i32, i32, i32) {
    %c0_i32 = arith.constant 0 : i32
    %c0_i32_0 = arith.constant 0 : i32
    %c0_i32_1 = arith.constant 0 : i32
    return %arg0, %c0_i32, %c0_i32_0 : i32, i32, i32
  }
  func.func @transform_3(%arg0: i32) -> (i32, i32) {
    %c0_i32 = arith.constant 0 : i32
    %c0_i32_0 = arith.constant 0 : i32
    %c0_i32_1 = arith.constant 0 : i32
    return %c0_i32, %c0_i32_0 : i32, i32
  }
  func.func @transform_4(%arg0: i32) -> (i32, i32) {
    %c0_i32 = arith.constant 0 : i32
    %c0_i32_0 = arith.constant 0 : i32
    %c0_i32_1 = arith.constant 0 : i32
    return %c0_i32, %c0_i32_0 : i32, i32
  }
  func.func @transform_5(%arg0: i32) -> (i32, i32, i32) {
    %c0_i32 = arith.constant 0 : i32
    %c0_i32_0 = arith.constant 0 : i32
    %c0_i32_1 = arith.constant 0 : i32
    %c0_i32_2 = arith.constant 0 : i32
    return %c0_i32, %c0_i32_0, %c0_i32_1 : i32, i32, i32
  }
  func.func @transform_6(%arg0: i32) -> (i32, i32) {
    %c0_i32 = arith.constant 0 : i32
    %c0_i32_0 = arith.constant 0 : i32
    %c0_i32_1 = arith.constant 0 : i32
    return %c0_i32, %c0_i32_0 : i32, i32
  }
  func.func @transform_7(%arg0: i32) -> (i32, i32) {
    %c0_i32 = arith.constant 0 : i32
    %c0_i32_0 = arith.constant 0 : i32
    %c0_i32_1 = arith.constant 0 : i32
    return %c0_i32, %c0_i32_0 : i32, i32
  }
  func.func @transform_8(%arg0: i32) -> (i32, i32) {
    %c0_i32 = arith.constant 0 : i32
    %c0_i32_0 = arith.constant 0 : i32
    %c0_i32_1 = arith.constant 0 : i32
    return %c0_i32, %c0_i32_0 : i32, i32
  }
  func.func @transform_9(%arg0: i32) -> (i32, i32) {
    %c0_i32 = arith.constant 0 : i32
    %c0_i32_0 = arith.constant 0 : i32
    %c0_i32_1 = arith.constant 0 : i32
    return %c0_i32, %c0_i32_0 : i32, i32
  }
  func.func @transform_10(%arg0: i32) -> (i32, i32) {
    %c0_i32 = arith.constant 0 : i32
    %c0_i32_0 = arith.constant 0 : i32
    %c0_i32_1 = arith.constant 0 : i32
    return %c0_i32, %c0_i32_0 : i32, i32
  }
  func.func @transform_11(%arg0: i32) -> (i32, i32) {
    %c0_i32 = arith.constant 0 : i32
    %c0_i32_0 = arith.constant 0 : i32
    %c0_i32_1 = arith.constant 0 : i32
    return %c0_i32, %c0_i32_0 : i32, i32
  }
  func.func @transform_12(%arg0: i32) -> (i32, i32) {
    %c0_i32 = arith.constant 0 : i32
    %c0_i32_0 = arith.constant 0 : i32
    %c0_i32_1 = arith.constant 0 : i32
    return %c0_i32, %c0_i32_0 : i32, i32
  }
  func.func @transform_13(%arg0: i32) -> (i32, i32) {
    %c0_i32 = arith.constant 0 : i32
    %c0_i32_0 = arith.constant 0 : i32
    %c0_i32_1 = arith.constant 0 : i32
    return %c0_i32, %c0_i32_0 : i32, i32
  }
  func.func @transform_14(%arg0: i32) -> (i32, i32) {
    %c0_i32 = arith.constant 0 : i32
    %c0_i32_0 = arith.constant 0 : i32
    %c0_i32_1 = arith.constant 0 : i32
    return %c0_i32, %c0_i32_0 : i32, i32
  }
  func.func @transform_15(%arg0: i32) -> (i32, i32) {
    %c0_i32 = arith.constant 0 : i32
    %c0_i32_0 = arith.constant 0 : i32
    %c0_i32_1 = arith.constant 0 : i32
    return %c0_i32, %c0_i32_0 : i32, i32
  }
  func.func @transform_16(%arg0: i32) -> (i32, i32) {
    %c0_i32 = arith.constant 0 : i32
    %c0_i32_0 = arith.constant 0 : i32
    %c0_i32_1 = arith.constant 0 : i32
    return %c0_i32, %c0_i32_0 : i32, i32
  }
  func.func @transform_17(%arg0: i32) -> (i32, i32) {
    %c0_i32 = arith.constant 0 : i32
    %c0_i32_0 = arith.constant 0 : i32
    %c0_i32_1 = arith.constant 0 : i32
    return %c0_i32, %c0_i32_0 : i32, i32
  }
  func.func @transform_18(%arg0: i32) -> (i32, i32) {
    %c0_i32 = arith.constant 0 : i32
    %c0_i32_0 = arith.constant 0 : i32
    %c0_i32_1 = arith.constant 0 : i32
    return %c0_i32, %c0_i32_0 : i32, i32
  }
  func.func @transform_19(%arg0: i32) -> (i32, i32) {
    %c0_i32 = arith.constant 0 : i32
    %c0_i32_0 = arith.constant 0 : i32
    %c0_i32_1 = arith.constant 0 : i32
    return %c0_i32, %c0_i32_0 : i32, i32
  }
  func.func @transform_20(%arg0: i32) -> (i32, i32) {
    %c0_i32 = arith.constant 0 : i32
    %c0_i32_0 = arith.constant 0 : i32
    %c0_i32_1 = arith.constant 0 : i32
    return %c0_i32, %c0_i32_0 : i32, i32
  }
  func.func @transform_21(%arg0: i32) -> (i32, i32) {
    %c0_i32 = arith.constant 0 : i32
    %c0_i32_0 = arith.constant 0 : i32
    %c0_i32_1 = arith.constant 0 : i32
    return %c0_i32, %c0_i32_0 : i32, i32
  }
  func.func @transform_22(%arg0: i32) -> (i32, i32) {
    %c0_i32 = arith.constant 0 : i32
    %c0_i32_0 = arith.constant 0 : i32
    %c0_i32_1 = arith.constant 0 : i32
    return %c0_i32, %c0_i32_0 : i32, i32
  }
  func.func @transform_23(%arg0: i32) -> (i32, i32) {
    %c0_i32 = arith.constant 0 : i32
    %c0_i32_0 = arith.constant 0 : i32
    %c0_i32_1 = arith.constant 0 : i32
    return %c0_i32, %c0_i32_0 : i32, i32
  }
  func.func @transform_24(%arg0: i32) -> (i32, i32) {
    %c0_i32 = arith.constant 0 : i32
    %c0_i32_0 = arith.constant 0 : i32
    %c0_i32_1 = arith.constant 0 : i32
    return %c0_i32, %c0_i32_0 : i32, i32
  }
  func.func @transform_25(%arg0: i32) -> (i32, i32) {
    %c0_i32 = arith.constant 0 : i32
    %c0_i32_0 = arith.constant 0 : i32
    %c0_i32_1 = arith.constant 0 : i32
    return %c0_i32, %c0_i32_0 : i32, i32
  }
  func.func @transform_26(%arg0: i32) -> (i32, i32, i32) {
    %c0_i32 = arith.constant 0 : i32
    %c0_i32_0 = arith.constant 0 : i32
    %c0_i32_1 = arith.constant 0 : i32
    return %arg0, %c0_i32, %c0_i32_0 : i32, i32, i32
  }
}

</mosaic_0001>

<bundles_post_ra>
// kernel: tpu_custom_call.1
= control target key start
LH: loop header
LB: loop body
LE: loop exit
PB: predicated region body
PF: predicated region fallthrough
CT: control target
= control target key end

     0   :  { %s2753_s0 = inlined_call_operand.hbm [shape: f32[2,8,32], index: 0, kind: input, shape index: {}]   ;;  %s2754_s1 = inlined_call_operand.vmem [shape: f32[2,16,32], index: 1, kind: input, shape index: {}]   ;;  %s2755_s2 = inlined_call_operand.hbm [shape: f32[2,1,16], index: 2, kind: input, shape index: {}]   ;;  %s2756_s3 = inlined_call_operand.vmem [shape: f32[32,8], index: 3, kind: input, shape index: {}]   ;;  %s2757_s4 = inlined_call_operand.vmem [shape: f32[8,32], index: 4, kind: input, shape index: {}]   ;;  %s2758_s5 = inlined_call_operand.hbm [shape: f32[8,1,32], index: 5, kind: input, shape index: {}]   ;;  %s2759_s6 = inlined_call_operand.hbm [shape: f32[32,32], index: 6, kind: input, shape index: {}]   ;;  %s2760_s7 = inlined_call_operand.vmem [shape: f32[1,32], index: 7, kind: input, shape index: {}]   ;;  %s2761_s8 = inlined_call_operand.hbm [shape: f32[32,32], index: 8, kind: input, shape index: {}]   ;;  %s2762_s9 = inlined_call_operand.vmem [shape: f32[1,32], index: 9, kind: input, shape index: {}]   ;;  %s2763_s10 = inlined_call_operand.hbm [shape: f32[32,32], index: 10, kind: input, shape index: {}]   ;;  %s2764_s11 = inlined_call_operand.vmem [shape: f32[1,32], index: 11, kind: input, shape index: {}]   ;;  %s2765_s12 = inlined_call_operand.vmem [shape: f32[1,32], index: 12, kind: input, shape index: {}]   ;;  %s2766_s13 = inlined_call_operand.vmem [shape: f32[1,32], index: 13, kind: input, shape index: {}]   ;;  %s2767_s14 = inlined_call_operand.vmem [shape: f32[1,32], index: 14, kind: input, shape index: {}]   ;;  %s2768_s15 = inlined_call_operand.vmem [shape: f32[1,32], index: 15, kind: input, shape index: {}]   ;;  %s2769_s16 = inlined_call_operand.hbm [shape: f32[32,32], index: 16, kind: input, shape index: {}]   ;;  %s2770_s17 = inlined_call_operand.vmem [shape: f32[1,32], index: 17, kind: input, shape index: {}]   ;;  %s2771_s18 = inlined_call_operand.vmem [shape: f32[1,32], index: 18, kind: input, shape index: {}]   ;;  %s2772_s19 = inlined_call_operand.vmem [shape: f32[1,32], index: 19, kind: input, shape index: {}]   ;;  %s2773_s20 = inlined_call_operand.hbm [shape: f32[32,32], index: 20, kind: input, shape index: {}]   ;;  %s2774_s21 = inlined_call_operand.vmem [shape: f32[1,32], index: 21, kind: input, shape index: {}]   ;;  %s2775_s22 = inlined_call_operand.hbm [shape: f32[32,32], index: 22, kind: input, shape index: {}]   ;;  %s2776_s23 = inlined_call_operand.vmem [shape: f32[1,32], index: 23, kind: input, shape index: {}]   ;;  %s2777_s24 = inlined_call_operand.vmem [shape: f32[1,32], index: 24, kind: input, shape index: {}]   ;;  %s2778_s25 = inlined_call_operand.vmem [shape: f32[1,32], index: 25, kind: input, shape index: {}]   ;;  %s2779_s26 = inlined_call_operand.hbm [shape: f32[2,8,32], index: 26, kind: output, shape index: {}]  }
   0x1   :  { %2784 = sst [smem:[#allocation24_spill]] %s2753_s0 }
   0x2   :  { %2785 = sst [smem:[#allocation25_spill]] %s2754_s1 }
   0x3   :  { %2786 = sst [smem:[#allocation26_spill]] %s2755_s2 }
   0x4   :  { %2787 = sst [smem:[#allocation27_spill]] %s2756_s3 }
   0x5   :  { %2788 = sst [smem:[#allocation28_spill]] %s2757_s4 }
   0x6   :  { %2789 = sst [smem:[#allocation29_spill]] %s2758_s5 }
   0x7   :  { %2790 = sst [smem:[#allocation30_spill]] %s2759_s6 }
   0x8   :  { %2791 = sst [smem:[#allocation31_spill]] %s2761_s8 }
   0x9   :  { %2792 = sst [smem:[#allocation32_spill]] %s2763_s10 }
   0xa   :  { %2793 = sst [smem:[#allocation33_spill]] %s2779_s26 }
   0xb   :  { %31 = vsyncpa [#allocation3], 0 }
   0xc   :  { %32 = vsyncpa [#allocation6], 0 }
   0xd   :  { %33 = vsyncpa [#allocation9], 0 }
   0xe   :  { %34 = vsyncpa [#allocation12], 0 }
   0xf   :  { %35 = vsyncpa [#allocation15], 0  ;;  %s2794_s27 = sld [smem:[#allocation26_spill]] }
  0x15   :  { %s56_s3 = sshll.u32 %s2794_s27, 4  ;;  %s57_s3 = int_to_ptr.hbm [resolvable:$true] %s56_s3 }
  0x16   :  { %36 = vsyncpa [#allocation4], 0  ;;  %s2058_s7 = smov [#allocation5]   ;;  %s2782_s28 = smov 16  }
  0x17   :  { %s58_s8 = sshll.u32 %s2058_s7, 4  ;;  %s2783_s4 = smov 1   ;;  %s59_s8 = int_to_ptr.vmem [resolvable:$true] %s58_s8 }
  0x18   :  { %64 = dma.hbm_to_vmem [thread:$0]  %s57_s3, 32, %s59_s8, [#allocation6], %s2782_s28, %s2782_s28, %s2783_s4  }
  0x19   :  { %s2795_s9 = sld [smem:[#allocation30_spill]]  ;;  %s2061_s2 = smov [#allocation8]  }
  0x1a   :  { %s88_s10 = sshll.u32 %s2061_s2, 4  ;;  %s2796_s11 = sld [smem:[#allocation32_spill]]  ;;  %s89_s10 = int_to_ptr.vmem [resolvable:$true] %s88_s10 }
  0x1b   :  { %s2062_s27 = smov 128   ;;  %s2063_s7 = smov 8  }
  0x1c   :  { %s158_s29 = sshll.u32 %s2773_s20, 4  ;;  %s2064_s0 = smov [#allocation11]   ;;  %s159_s29 = int_to_ptr.hbm [resolvable:$true] %s158_s29 }
  0x1d   :  { %s2065_s2 = smov [#allocation14]   ;;  %s2797_s28 = sld [smem:[#allocation24_spill]] }
  0x1e   :  { %s160_s5 = sshll.u32 %s2065_s2, 4  ;;  %s2066_s8 = smov [#allocation2]   ;;  %s161_s5 = int_to_ptr.vmem [resolvable:$true] %s160_s5 }
  0x1f   :  { %s86_s30 = sshll.u32 %s2795_s9, 4  ;;  %s118_s9 = sshll.u32 %s2064_s0, 4  ;;  %s87_s30 = int_to_ptr.hbm [resolvable:$true] %s86_s30  ;;  %s119_s9 = int_to_ptr.vmem [resolvable:$true] %s118_s9 }
  0x20   :  { %s116_s1 = sshll.u32 %s2796_s11, 4  ;;  %s43_s0 = sshll.u32 %s2066_s8, 4  ;;  %s117_s1 = int_to_ptr.hbm [resolvable:$true] %s116_s1  ;;  %s44_s0 = int_to_ptr.vmem [resolvable:$true] %s43_s0 }
  0x21   :  { %94 = dma.hbm_to_vmem [thread:$0]  %s87_s30, 512, %s89_s10, [#allocation9], %s2062_s27, %s2062_s27, %s2063_s7  }
  0x22   :  { %124 = dma.hbm_to_vmem [thread:$0]  %s117_s1, 512, %s119_s9, [#allocation12], %s2062_s27, %s2062_s27, %s2063_s7  }
  0x23   :  { %s41_s4 = sshll.u32 %s2797_s28, 4  ;;  %s2798_s10 = sld [smem:[#allocation29_spill]]  ;;  %s42_s4 = int_to_ptr.hbm [resolvable:$true] %s41_s4 }
  0x24   :  { %166 = dma.hbm_to_vmem [thread:$0]  %s159_s29, 512, %s161_s5, [#allocation15], %s2062_s27, %s2062_s27, %s2063_s7  }
  0x25   :  { %49 = dma.hbm_to_vmem [thread:$0]  %s42_s4, 256, %s44_s0, [#allocation3], %s2062_s27, %s2062_s27, %s2063_s7  }
  0x26   :  { %s2067_s1 = smov [#allocation7]   ;;  %s2799_s6 = sld [smem:[#allocation31_spill]] }
  0x27   :  { %s75_s28 = sshll.u32 %s2067_s1, 4  ;;  %s2800_s29 = smov 1   ;;  %s76_s28 = int_to_ptr.vmem [resolvable:$true] %s75_s28 }
  0x28   :  { %s2801_s5 = smov 16   ;;  %s2068_s8 = smov [#allocation10]  }
  0x29   :  { %s73_s3 = sshll.u32 %s2798_s10, 4  ;;  %s139_s10 = sshll.u32 %s2769_s16, 4  ;;  %s74_s3 = int_to_ptr.hbm [resolvable:$true] %s73_s3  ;;  %s140_s10 = int_to_ptr.hbm [resolvable:$true] %s139_s10 }
  0x2a   :  { %81 = dma.hbm_to_vmem [thread:$0]  %s74_s3, 128, %s76_s28, [#allocation6], %s2801_s5, %s2801_s5, %s2800_s29  }
  0x2b   :  { %s103_s26 = sshll.u32 %s2068_s8, 4  ;;  %s2069_s4 = smov [#allocation13]   ;;  %s104_s26 = int_to_ptr.vmem [resolvable:$true] %s103_s26 }
  0x2c   :  { %s101_s11 = sshll.u32 %s2799_s6, 4  ;;  %s141_s0 = sshll.u32 %s2069_s4, 4  ;;  %s102_s11 = int_to_ptr.hbm [resolvable:$true] %s101_s11  ;;  %s142_s0 = int_to_ptr.vmem [resolvable:$true] %s141_s0 }
  0x2d   :  { %109 = dma.hbm_to_vmem [thread:$0]  %s102_s11, 512, %s104_s26, [#allocation9], %s2062_s27, %s2062_s27, %s2063_s7  }
  0x2e   :  { %s173_s2 = sshll.u32 %s2775_s22, 4  ;;  %s2070_s16 = smov [#allocation16]   ;;  %s174_s2 = int_to_ptr.hbm [resolvable:$true] %s173_s2 }
  0x2f   :  { %147 = dma.hbm_to_vmem [thread:$0]  %s140_s10, 512, %s142_s0, [#allocation12], %s2062_s27, %s2062_s27, %s2063_s7  }
  0x30   :  { %s175_s3 = sshll.u32 %s2070_s16, 4  ;;  %s176_s3 = int_to_ptr.vmem [resolvable:$true] %s175_s3 }
  0x31   :  { %181 = dma.hbm_to_vmem [thread:$0]  %s174_s2, 512, %s176_s3, [#allocation15], %s2062_s27, %s2062_s27, %s2063_s7  }
  0x32   :  { %2046 = dma.done.wait [#allocation3], 256  }
  0x33   :  { %2047 = vsyncadd [#allocation3], 4294967040 }
  0x34   :  { %2048 = dma.done.wait [#allocation6], 160  }
  0x35   :  { %2049 = vsyncadd [#allocation6], 4294967136 }
  0x36   :  { %2050 = dma.done.wait [#allocation9], 1024  }
  0x37   :  { %2051 = vsyncadd [#allocation9], 4294966272 }
  0x38   :  { %2052 = dma.done.wait [#allocation12], 1024  }
  0x39   :  { %2053 = vsyncadd [#allocation12], 4294966272 }
  0x3a   :  { %2054 = dma.done.wait [#allocation15], 1024  }
  0x3b   :  { %2055 = vsyncadd [#allocation15], 4294966272  ;;  %v233_v0 = vld [vmem:[#allocation8 + $0x18] sm:$0xff]  ;;  %v232_v1 = vld [vmem:[#allocation8 + $0x10] sm:$0xff]  ;;  %vm234_vm0 = vcmask 261120   ;;  %s2802_s28 = sld [smem:[#allocation25_spill]] }
  0x3c   :  { %253 = vmatpush.msra.mxu0 %v233_v0  ;;  %v267_v2 = vld [vmem:[#allocation10 + $0x18] sm:$0xff]  ;;  %v231_v3 = vld [vmem:[#allocation8 + $0x8] sm:$0xff]  ;;  %v266_v4 = vld [vmem:[#allocation10 + $0x10] sm:$0xff]  ;;  %s2803_s29 = sld [smem:[#allocation27_spill]]  ;;  %vm417_vm1 = vcmask 64512  }
  0x3d   :  { %292 = vmatpush.msra.mxu1 %v267_v2  ;;  %v265_v5 = vld [vmem:[#allocation10 + $0x8] sm:$0xff]  ;;  %v230_v6 = vld [vmem:[#allocation8] sm:$0xff]  ;;  %v312_v8 = vld [vmem:[#allocation11 + $0x18] sm:$0xff]  ;;  %s2809_s26 = sld [smem:[#allocation33_spill]] }
  0x3e   :  { %254 = vmatpush.msra.mxu0 %v232_v1  ;;  %v224_v7 = vld [vmem:[#allocation2] sm:$0xff]  ;;  %325 = vmatpush.msra.mxu2 %v312_v8  ;;  %v311_v11 = vld [vmem:[#allocation11 + $0x10] sm:$0xff] }
  0x3f   :  { %293 = vmatpush.msra.mxu1 %v266_v4  ;;  %v264_v9 = vld [vmem:[#allocation10] sm:$0xff]  ;;  %v310_v12 = vld [vmem:[#allocation11 + $0x8] sm:$0xff] }
  0x40   :  { %255 = vmatpush.msra.mxu0 %v231_v3  ;;  %v309_v13 = vld [vmem:[#allocation11] sm:$0xff]  ;;  %326 = vmatpush.msra.mxu2 %v311_v11  ;;  %v225_v17 = vld [vmem:[#allocation2 + $0x8] sm:$0xff] }
  0x41   :  { %v226_v10 = vld [vmem:[%s2802_s28] sm:$0xff]  ;;  %294 = vmatpush.msra.mxu1 %v265_v5  ;;  %v227_v18 = vld [vmem:[%s2802_s28 + $0x8] sm:$0xff]  ;;  %v228_v19 = vld [vmem:[%s2802_s28 + $0x10] sm:$0xff] }
  0x42   :  { %v345_v14 = vld [vmem:[%s2803_s29 + $0x18] sm:$0xff]  ;;  %256 = vmatpush.msra.mxu0 %v230_v6  ;;  %v344_v15 = vld [vmem:[%s2803_s29 + $0x10] sm:$0xff]  ;;  %327 = vmatpush.msra.mxu2 %v310_v12  ;;  %v343_v16 = vld [vmem:[%s2803_s29 + $0x8] sm:$0xff] }
  0x43   :  { %1606 = vmatmul.msk.f32.vlgmr.msra.gmra.mxu0 %vm234_vm0, %v224_v7  ;;  %295 = vmatpush.msra.mxu1 %v264_v9  ;;  %v229_v20 = vld [vmem:[%s2802_s28 + $0x18] sm:$0xff]  ;;  %v342_v21 = vld [vmem:[%s2803_s29] sm:$0xff]  ;;  %s2804_s28 = sld [smem:[#allocation28_spill]] }
  0x44   :  { %1608 = vmatmul.msk.f32.vlgmr.msra.gmra.mxu1 %vm234_vm0, %v226_v10  ;;  %367 = vmatpush.msra.mxu3 %v345_v14 }
  0x45   :  { %398 = vmatpush.msrb.mxu0 %v345_v14  ;;  %328 = vmatpush.msra.mxu2 %v309_v13 }
  0x46   :  { %536 = vmatpush.msrb.mxu1 %v345_v14  ;;  %1612 = vmatmul.msk.f32.vlgmr.msra.gmra.mxu2 %vm234_vm0, %v226_v10 }
  0x47   :  { %368 = vmatpush.msra.mxu3 %v344_v15  ;;  %399 = vmatpush.msrb.mxu0 %v344_v15 }
  0x48   :  { %581 = vmatpush.msrb.mxu2 %v345_v14  ;;  %537 = vmatpush.msrb.mxu1 %v344_v15 }
  0x49   :  { %369 = vmatpush.msra.mxu3 %v343_v16  ;;  %400 = vmatpush.msrb.mxu0 %v343_v16  ;;  %v346_v35 = vld [vmem:[%s2804_s28] sm:$0xff]  ;;  %s1589_s28 = sshll.u32 %s2809_s26, 4  ;;  %s1590_s28 = int_to_ptr.hbm [resolvable:$true] %s1589_s28 }
  0x4a   :  { %582 = vmatpush.msrb.mxu2 %v344_v15  ;;  %538 = vmatpush.msrb.mxu1 %v343_v16 }
  0x4b   :  { %1607 = vmatmul.msk.f32.gmra.mxu0 %vm234_vm0, %v225_v17  ;;  %370 = vmatpush.msra.mxu3 %v342_v21 }
  0x4c   :  { %1609 = vmatmul.msk.f32.gmra.mxu1 %vm234_vm0, %v227_v18  ;;  %583 = vmatpush.msrb.mxu2 %v343_v16 }
  0x4d   :  { %401 = vmatpush.msrb.mxu0 %v342_v21  ;;  %539 = vmatpush.msrb.mxu1 %v342_v21 }
  0x4e   :  { %1613 = vmatmul.msk.f32.gmra.mxu2 %vm234_vm0, %v227_v18  ;;  %439 = vmatpush.msrb.mxu3 %v346_v35 }
  0x4f   :  { %584 = vmatpush.msrb.mxu2 %v342_v21  ;;  %470 = vmatpush.msra.mxu0 %v346_v35 }
  0x54   :  { %1610 = vmatmul.msk.f32.gmra.mxu1 %vm234_vm0, %v228_v19 }
  0x56   :  { %1614 = vmatmul.msk.f32.gmra.mxu2 %vm234_vm0, %v228_v19 }
  0x5c   :  { %1611 = vmatmul.msk.f32.gmra.mxu1 %vm234_vm0, %v229_v20 }
  0x5e   :  { %1615 = vmatmul.msk.f32.gmra.mxu2 %vm234_vm0, %v229_v20 }
  0xc0   :  { %v2296_v22 = vpop.f32.mrf.mxu0 }
  0xc1   :  { %v378_v23 = vmul.f32 %v2296_v22, %v2296_v22  ;;  %1616 = vmatmul.msk.f32.vlgmr.msra.gmra.mxu3 %vm234_vm0, %v2296_v22  ;;  %v2302_v24 = vpop.f32.mrf.mxu1 }
  0xc2   :  { %v553_v25 = vmul.f32 %v2302_v24, %v2302_v24  ;;  %1624 = vmatmul.msk.f32.vlgmr.msrb.gmra.mxu1 %vm234_vm0, %v2302_v24  ;;  %641 = vmatpush.msra.mxu3 %v346_v35 }
  0xc3   :  { %1618 = vmatmul.msk.f32.vlgmr.msrb.gmra.mxu0 %vm234_vm0, %v378_v23 }
  0xc4   :  { %1628 = vmatmul.msk.f32.vlgmr.msrb.gmra.mxu2 %vm234_vm0, %v553_v25  ;;  %686 = vmatpush.msrb.mxu0 %v346_v35 }
  0xc8   :  { %v2310_v26 = vpop.f32.mrf.mxu0 }
  0xc9   :  { %v379_v27 = vmul.f32 %v2310_v26, %v2310_v26  ;;  %1617 = vmatmul.msk.f32.gmra.mxu3 %vm234_vm0, %v2310_v26  ;;  %v2316_v28 = vpop.f32.mrf.mxu1  ;;  %v330_v34 = vpop.f32.mrf.mxu2 }
  0xca   :  { %v554_v29 = vmul.f32 %v2316_v28, %v2316_v28  ;;  %1625 = vmatmul.msk.f32.gmra.mxu1 %vm234_vm0, %v2316_v28 }
  0xcb   :  { %1619 = vmatmul.msk.f32.gmra.mxu0 %vm234_vm0, %v379_v27 }
  0xcc   :  { %1629 = vmatmul.msk.f32.gmra.mxu2 %vm234_vm0, %v554_v29 }
  0xd1   :  { %v2324_v30 = vpop.f32.mrf.mxu1  ;;  %v333_v36 = vpop.f32.mrf.mxu2 }
  0xd2   :  { %v555_v31 = vmul.f32 %v2324_v30, %v2324_v30  ;;  %1626 = vmatmul.msk.f32.gmra.mxu1 %vm234_vm0, %v2324_v30 }
  0xd4   :  { %1630 = vmatmul.msk.f32.gmra.mxu2 %vm234_vm0, %v555_v31 }
  0xd9   :  { %v2331_v32 = vpop.f32.mrf.mxu1  ;;  %v336_v37 = vpop.f32.mrf.mxu2 }
  0xda   :  { %v556_v33 = vmul.f32 %v2331_v32, %v2331_v32  ;;  %1627 = vmatmul.msk.f32.gmra.mxu1 %vm234_vm0, %v2331_v32 }
  0xdc   :  { %1631 = vmatmul.msk.f32.gmra.mxu2 %vm234_vm0, %v556_v33 }
  0xe1   :  { %v339_v38 = vpop.f32.mrf.mxu2 }
 0x13f   :  { %v541_v44 = vpop.f32.mrf.mxu1 }
 0x140   :  { %v403_v39 = vpop.f32.mrf.mxu0  ;;  %v598_v52 = vmul.f32 0.25, %v541_v44 }
 0x141   :  { %v411_v42 = vmul.f32 0.25, %v403_v39 }
 0x142   :  { %v606_v55 = vmul.f32 %v598_v52, %v598_v52 }
 0x144   :  { %v372_v40 = vpop.f32.mrf.mxu3 }
 0x145   :  { %v409_v41 = vmul.f32 0.25, %v372_v40 }
 0x147   :  { %v413_v43 = vmul.f32 %v409_v41, %v409_v41  ;;  %1620 = vmatmul.msk.f32.vlgmr.msrb.gmra.mxu3 %vm417_vm1, %v409_v41  ;;  %v586_v46 = vpop.f32.mrf.mxu2  ;;  %v544_v54 = vpop.f32.mrf.mxu1 }
 0x148   :  { %1207 = vmatpush.msrb.mxu3 %v333_v36  ;;  %v406_v47 = vpop.f32.mrf.mxu0  ;;  %v602_v56 = vmul.f32 0.25, %v586_v46  ;;  %v599_v59 = vmul.f32 0.25, %v544_v54 }
 0x149   :  { %v415_v45 = vsub.f32 %v411_v42, %v413_v43  ;;  %v412_v50 = vmul.f32 0.25, %v406_v47 }
 0x14a   :  { %1208 = vmatpush.msrb.mxu3 %v330_v34  ;;  %v610_v58 = vsub.f32 %v602_v56, %v606_v55  ;;  %v607_v61 = vmul.f32 %v599_v59, %v599_v59 }
 0x14b   :  { %1622 = vmatmul.msk.f32.vlgmr.msra.gmra.mxu0 %vm417_vm1, %v415_v45 }
 0x14c   :  { %1272 = vmatpush.msra.mxu0 %v339_v38  ;;  %v375_v48 = vpop.f32.mrf.mxu3 }
 0x14d   :  { %v410_v49 = vmul.f32 0.25, %v375_v48 }
 0x14e   :  { %1273 = vmatpush.msra.mxu0 %v336_v37 }
 0x14f   :  { %v414_v51 = vmul.f32 %v410_v49, %v410_v49  ;;  %1621 = vmatmul.msk.f32.gmra.mxu3 %vm417_vm1, %v410_v49  ;;  %v589_v57 = vpop.f32.mrf.mxu2  ;;  %v547_v60 = vpop.f32.mrf.mxu1 }
 0x150   :  { %v603_v62 = vmul.f32 0.25, %v589_v57  ;;  %v600_v1 = vmul.f32 0.25, %v547_v60 }
 0x151   :  { %v416_v53 = vsub.f32 %v412_v50, %v414_v51 }
 0x152   :  { %v611_v0 = vsub.f32 %v603_v62, %v607_v61  ;;  %v608_v2 = vmul.f32 %v600_v1, %v600_v1  ;;  %v1699_v62 = vld [vmem:[%s2765_s12] ss:$0 sm:$0xff] }
 0x153   :  { %1623 = vmatmul.msk.f32.gmra.mxu0 %vm417_vm1, %v416_v53 }
 0x157   :  { %1632 = vmatmul.msk.f32.vlgmr.msra.gmra.mxu3 %vm417_vm1, %v598_v52  ;;  %v592_v63 = vpop.f32.mrf.mxu2  ;;  %v550_v4 = vpop.f32.mrf.mxu1 }
 0x158   :  { %v604_v3 = vmul.f32 0.25, %v592_v63  ;;  %v601_v6 = vmul.f32 0.25, %v550_v4 }
 0x15a   :  { %v612_v5 = vsub.f32 %v604_v3, %v608_v2  ;;  %v609_v8 = vmul.f32 %v601_v6, %v601_v6  ;;  %v1701_v3 = vld [vmem:[%s2767_s14] ss:$0 sm:$0xff] }
 0x15b   :  { %1636 = vmatmul.msk.f32.vlgmr.msrb.gmra.mxu0 %vm417_vm1, %v610_v58 }
 0x15f   :  { %1633 = vmatmul.msk.f32.gmra.mxu3 %vm417_vm1, %v599_v59  ;;  %v595_v7 = vpop.f32.mrf.mxu2 }
 0x160   :  { %v605_v9 = vmul.f32 0.25, %v595_v7 }
 0x162   :  { %v613_v10 = vsub.f32 %v605_v9, %v609_v8  ;;  %v1700_v8 = vld [vmem:[%s2766_s13] ss:$0 sm:$0xff] }
 0x163   :  { %1637 = vmatmul.msk.f32.gmra.mxu0 %vm417_vm1, %v611_v0 }
 0x167   :  { %1634 = vmatmul.msk.f32.gmra.mxu3 %vm417_vm1, %v600_v1 }
 0x16b   :  { %1638 = vmatmul.msk.f32.gmra.mxu0 %vm417_vm1, %v612_v5 }
 0x16f   :  { %1635 = vmatmul.msk.f32.gmra.mxu3 %vm417_vm1, %v601_v6 }
 0x173   :  { %1639 = vmatmul.msk.f32.gmra.mxu0 %vm417_vm1, %v613_v10 }
 0x1c8   :  { %v472_v11 = vpop.f32.mrf.mxu0 }
 0x1c9   :  { %v473_v13 = vadd.f32 1e-05, %v472_v11 }
 0x1ca   :  { %v441_v12 = vpop.f32.mrf.mxu3 }
 0x1cb   :  { %1718 = vrsqrt.f32 %v473_v13  ;;  %vm484_vm4 = vweird.f32 %v473_v13  ;;  %v447_v53 = vsub.f32 %v2296_v22, %v441_v12 }
 0x1d0   :  { %v475_v14 = vpop.f32.mrf.mxu0 }
 0x1d1   :  { %v1719_v18 = vpop.eup %1718  ;;  %v2355_v20 = vadd.f32 1e-05, %v475_v14 }
 0x1d2   :  { %v2353_v15 = vpop.f32.mrf.mxu3  ;;  %v479_v19 = vmul.f32 %v1719_v18, %v473_v13  ;;  %vm485_vm2 = vweird.f32 %v1719_v18 }
 0x1d3   :  { %vm2365_vm5 = vmor %vm484_vm4, %vm485_vm2  ;;  %vm494_vm13 = vweird.f32 %v2355_v20 }
 0x1d4   :  { %v480_v25 = vmul.f32 %v1719_v18, %v479_v19 }
 0x1d6   :  { %v481_v34 = vmul.f32 0.5, %v480_v25 }
 0x1d8   :  { %v688_v16 = vpop.f32.mrf.mxu0  ;;  %v482_v38 = vsub.f32 1.5, %v481_v34 }
 0x1d9   :  { %v689_v17 = vadd.f32 1e-05, %v688_v16 }
 0x1da   :  { %v643_v31 = vpop.f32.mrf.mxu3  ;;  %v483_v45 = vmul.f32 %v1719_v18, %v482_v38 }
 0x1db   :  { %1720 = vrsqrt.f32 %v689_v17  ;;  %vm706_vm6 = vweird.f32 %v689_v17  ;;  %v655_v60 = vsub.f32 %v2302_v24, %v643_v31 }
 0x1dc   :  { %v487_v54 = vsel %vm2365_vm5, %v1719_v18, %v483_v45  ;;  %v2395_v18 = vld [vmem:[#allocation7] ss:$0 sm:$0xff]  ;;  %vm992_vm5 = vcmask 130048  }
 0x1dd   :  { %v498_v22 = vmul.f32 %v487_v54, %v447_v53  ;;  %v2440_v53 = vld [vmem:[#allocation7 + $0x4] ss:$0 sm:$0xff] }
 0x1df   :  { %v503_v7 = vmul.f32 %v1699_v62, %v498_v22  ;;  %v2461_v22 = vld [vmem:[#allocation7 + $0x7] ss:$0 sm:$0xff] }
 0x1e0   :  { %v691_v21 = vpop.f32.mrf.mxu0 }
 0x1e1   :  { %v1721_v23 = vpop.eup %1720  ;;  %v692_v27 = vadd.f32 1e-05, %v691_v21  ;;  %v2393_v16 = vadd.f32 %v1700_v8, %v503_v7 }
 0x1e2   :  { %v701_v29 = vmul.f32 %v1721_v23, %v689_v17  ;;  %v646_v44 = vpop.f32.mrf.mxu3  ;;  %vm707_vm3 = vweird.f32 %v1721_v23 }
 0x1e3   :  { %1722 = vrsqrt.f32 %v692_v27  ;;  %vm708_vm8 = vmor %vm706_vm6, %vm707_vm3  ;;  %vm716_vm9 = vweird.f32 %v692_v27  ;;  %v656_v61 = vsub.f32 %v2316_v28, %v646_v44  ;;  %v1702_v28 = vld [vmem:[%s2768_s15] ss:$0 sm:$0xff]  ;;  %v794_v54 = vmul.f32 %v2440_v53, %v2393_v16 }
 0x1e4   :  { %1724 = vrsqrt.f32 %v2355_v20  ;;  %v702_v33 = vmul.f32 %v1721_v23, %v701_v29 }
 0x1e6   :  { %v703_v35 = vmul.f32 0.5, %v702_v33  ;;  %v790_v33 = vmul.f32 %v2395_v18, %v2393_v16 }
 0x1e8   :  { %v694_v36 = vpop.f32.mrf.mxu0  ;;  %v704_v41 = vsub.f32 1.5, %v703_v35 }
 0x1e9   :  { %v1723_v37 = vpop.eup %1722  ;;  %v2358_v39 = vadd.f32 1e-05, %v694_v36 }
 0x1ea   :  { %v2360_v40 = vpop.eup %1724  ;;  %v711_v42 = vmul.f32 %v1723_v37, %v692_v27  ;;  %v705_v47 = vmul.f32 %v1721_v23, %v704_v41  ;;  %vm717_vm7 = vweird.f32 %v1723_v37  ;;  %v649_v5 = vpop.f32.mrf.mxu3 }
 0x1eb   :  { %1726 = vrsqrt.f32 %v2358_v39  ;;  %v489_v46 = vmul.f32 %v2360_v40, %v2355_v20  ;;  %vm718_vm10 = vmor %vm716_vm9, %vm717_vm7  ;;  %vm495_vm11 = vweird.f32 %v2360_v40  ;;  %vm726_vm15 = vweird.f32 %v2358_v39 }
 0x1ec   :  { %v712_v43 = vmul.f32 %v1723_v37, %v711_v42  ;;  %v709_v57 = vsel %vm708_vm8, %v1721_v23, %v705_v47  ;;  %vm2403_vm14 = vmor %vm494_vm13, %vm495_vm11  ;;  %v448_v20 = vsub.f32 %v2310_v26, %v2353_v15  ;;  %v2419_v42 = vld [vmem:[#allocation7 + $0x1] ss:$0 sm:$0xff] }
 0x1ed   :  { %v490_v55 = vmul.f32 %v2360_v40, %v489_v46  ;;  %v740_v2 = vmul.f32 %v709_v57, %v655_v60  ;;  %v791_v26 = vmul.f32 %v2419_v42, %v2393_v16 }
 0x1ee   :  { %v713_v48 = vmul.f32 0.5, %v712_v43 }
 0x1ef   :  { %v491_v1 = vmul.f32 0.5, %v490_v55  ;;  %v747_v11 = vmul.f32 %v1701_v3, %v740_v2  ;;  %v964_v2 = vld [vmem:[#allocation5] sm:$0x1] }
 0x1f0   :  { %v714_v50 = vsub.f32 1.5, %v713_v48  ;;  %v697_v51 = vpop.f32.mrf.mxu0 }
 0x1f1   :  { %v2369_v52 = vpop.eup %1726  ;;  %v698_v56 = vadd.f32 1e-05, %v697_v51  ;;  %v492_v10 = vsub.f32 1.5, %v491_v1  ;;  %v754_v21 = vadd.f32 %v1702_v28, %v747_v11 }
 0x1f2   :  { %v715_v58 = vmul.f32 %v1723_v37, %v714_v50  ;;  %v721_v59 = vmul.f32 %v2369_v52, %v2358_v39  ;;  %vm727_vm12 = vweird.f32 %v2369_v52  ;;  %v652_v31 = vpop.f32.mrf.mxu3  ;;  %v2433_v50 = vld [vmem:[#allocation7 + $0x3] ss:$0 sm:$0xff] }
 0x1f3   :  { %1728 = vrsqrt.f32 %v698_v56  ;;  %v493_v19 = vmul.f32 %v2360_v40, %v492_v10  ;;  %vm728_vm2 = vmor %vm726_vm15, %vm727_vm12  ;;  %vm736_vm3 = vweird.f32 %v698_v56  ;;  %v658_v38 = vsub.f32 %v2331_v32, %v652_v31  ;;  %v2425_v32 = vld [vmem:[#allocation7 + $0x2] ss:$0 sm:$0xff]  ;;  %v965_v10 = vld [vmem:[#allocation5 + $0x1] sm:$0x1] }
 0x1f4   :  { %v719_v63 = vsel %vm718_vm10, %v1723_v37, %v715_v58  ;;  %v722_v0 = vmul.f32 %v2369_v52, %v721_v59  ;;  %v657_v37 = vsub.f32 %v2324_v30, %v649_v5  ;;  %v792_v48 = vmul.f32 %v2425_v32, %v2393_v16  ;;  %v2454_v59 = vld [vmem:[#allocation7 + $0x6] ss:$0 sm:$0xff] }
 0x1f5   :  { %v741_v4 = vmul.f32 %v719_v63, %v656_v61  ;;  %v497_v34 = vsel %vm2403_vm14, %v2360_v40, %v493_v19  ;;  %v793_v51 = vmul.f32 %v2433_v50, %v2393_v16  ;;  %v796_v60 = vmul.f32 %v2454_v59, %v2393_v16 }
 0x1f6   :  { %v723_v24 = vmul.f32 0.5, %v722_v0  ;;  %v499_v39 = vmul.f32 %v497_v34, %v448_v20 }
 0x1f7   :  { %v748_v6 = vmul.f32 %v1701_v3, %v741_v4 }
 0x1f8   :  { %v724_v13 = vsub.f32 1.5, %v723_v24  ;;  %v504_v45 = vmul.f32 %v1699_v62, %v499_v39  ;;  %v797_v62 = vmul.f32 %v2461_v22, %v2393_v16 }
 0x1f9   :  { %v1729_v9 = vpop.eup %1728  ;;  %v755_v12 = vadd.f32 %v1702_v28, %v748_v6 }
 0x1fa   :  { %v731_v14 = vmul.f32 %v1729_v9, %v698_v56  ;;  %v725_v23 = vmul.f32 %v2369_v52, %v724_v13  ;;  %vm737_vm1 = vweird.f32 %v1729_v9  ;;  %v509_v30 = vadd.f32 %v1700_v8, %v504_v45  ;;  %v2447_v56 = vld [vmem:[#allocation7 + $0x5] ss:$0 sm:$0xff] }
 0x1fb   :  { %1640 = vmatpush.xpose.msk.msra.mxu1 %vm234_vm0, %v755_v12  ;;  %vm738_vm4 = vmor %vm736_vm3, %vm737_vm1  ;;  %v795_v57 = vmul.f32 %v2447_v56, %v2393_v16  ;;  %v1661_v13 = vadd.f32 -1.0, %v965_v10 }
 0x1fc   :  { %v732_v17 = vmul.f32 %v1729_v9, %v731_v14  ;;  %v729_v35 = vsel %vm728_vm2, %v2369_v52, %v725_v23  ;;  %v798_v49 = vmul.f32 %v2395_v18, %v509_v30  ;;  %v799_v52 = vmul.f32 %v2419_v42, %v509_v30 }
 0x1fd   :  { %v742_v40 = vmul.f32 %v729_v35, %v657_v37  ;;  %v800_v55 = vmul.f32 %v2425_v32, %v509_v30  ;;  %v801_v58 = vmul.f32 %v2433_v50, %v509_v30  ;;  %v802_v61 = vmul.f32 %v2440_v53, %v509_v30 }
 0x1fe   :  { %v733_v25 = vmul.f32 0.5, %v732_v17  ;;  %v803_v63 = vmul.f32 %v2447_v56, %v509_v30  ;;  %v804_v0 = vmul.f32 %v2454_v59, %v509_v30  ;;  %v805_v1 = vmul.f32 %v2461_v22, %v509_v30 }
 0x1ff   :  { %1641 = vmatpush.xpose.msk.msra.mxu1 %vm234_vm0, %v754_v21  ;;  %v749_v15 = vmul.f32 %v1701_v3, %v742_v40  ;;  %v969_v16 = vmul.f32 1e+30, %v1661_v13 }
 0x200   :  { %v734_v29 = vsub.f32 1.5, %v733_v25 }
 0x201   :  { %v756_v47 = vadd.f32 %v1702_v28, %v749_v15  ;;  %v2484_v17 = vperm.slane %v969_v16, 0 }
 0x202   :  { %v735_v36 = vmul.f32 %v1729_v9, %v734_v29  ;;  %1642 = vmatmul.msk.f32.vlgmr.msra.gmra.mxu1 %vm234_vm0, %v790_v33 }
 0x204   :  { %v739_v41 = vsel %vm738_vm4, %v1729_v9, %v735_v36 }
 0x205   :  { %v743_v43 = vmul.f32 %v739_v41, %v658_v38 }
 0x207   :  { %v750_v44 = vmul.f32 %v1701_v3, %v743_v43  ;;  %v1660_v3 = vadd.f32 -1.0, %v964_v2 }
 0x209   :  { %v757_v46 = vadd.f32 %v1702_v28, %v750_v44  ;;  %v968_v4 = vmul.f32 1e+30, %v1660_v3 }
 0x20a   :  { %1643 = vmatmul.msk.f32.gmra.mxu1 %vm234_vm0, %v791_v26 }
 0x20b   :  { %1650 = vmatpush.xpose.msk.msra.mxu2 %vm234_vm0, %v757_v46  ;;  %v2472_v24 = vperm.slane %v968_v4, 0 }
 0x20f   :  { %1651 = vmatpush.xpose.msk.msra.mxu2 %vm234_vm0, %v756_v47 }
 0x212   :  { %1644 = vmatmul.msk.f32.gmra.mxu1 %vm234_vm0, %v792_v48  ;;  %1652 = vmatmul.msk.f32.vlgmr.msra.gmra.mxu2 %vm234_vm0, %v798_v49 }
 0x21a   :  { %1645 = vmatmul.msk.f32.gmra.mxu1 %vm234_vm0, %v793_v51  ;;  %1653 = vmatmul.msk.f32.gmra.mxu2 %vm234_vm0, %v799_v52 }
 0x222   :  { %1646 = vmatmul.msk.f32.gmra.mxu1 %vm234_vm0, %v794_v54  ;;  %1654 = vmatmul.msk.f32.gmra.mxu2 %vm234_vm0, %v800_v55 }
 0x22a   :  { %1647 = vmatmul.msk.f32.gmra.mxu1 %vm234_vm0, %v795_v57  ;;  %1655 = vmatmul.msk.f32.gmra.mxu2 %vm234_vm0, %v801_v58 }
 0x232   :  { %1648 = vmatmul.msk.f32.gmra.mxu1 %vm234_vm0, %v796_v60  ;;  %1656 = vmatmul.msk.f32.gmra.mxu2 %vm234_vm0, %v802_v61 }
 0x23a   :  { %1649 = vmatmul.msk.f32.gmra.mxu1 %vm234_vm0, %v797_v62  ;;  %1657 = vmatmul.msk.f32.gmra.mxu2 %vm234_vm0, %v803_v63 }
 0x242   :  { %1658 = vmatmul.msk.f32.gmra.mxu2 %vm234_vm0, %v804_v0 }
 0x24a   :  { %1659 = vmatmul.msk.f32.gmra.mxu2 %vm234_vm0, %v805_v1 }
 0x27f   :  { %v853_v5 = vpop.f32.mrf.mxu1 }
 0x280   :  { %v948_v28 = vmul.f32 0.5, %v853_v5 }
 0x282   :  { %v2475_v6 = vadd.f32 %v2472_v24, %v948_v28 }
 0x284   :  { %v993_v7 = vsel %vm992_vm5, %v2475_v6, -inf }
 0x285   :  { %994 = vmax.xlane.f32.xlu0 %v993_v7 }
 0x287   :  { %v856_v8 = vpop.f32.mrf.mxu1 }
 0x288   :  { %v949_v9 = vmul.f32 0.5, %v856_v8 }
 0x28a   :  { %v2480_v11 = vadd.f32 %v2472_v24, %v949_v9 }
 0x28c   :  { %v996_v12 = vsel %vm992_vm5, %v2480_v11, -inf }
 0x28d   :  { %997 = vmax.xlane.f32.xlu0 %v996_v12 }
 0x28f   :  { %v859_v14 = vpop.f32.mrf.mxu1 }
 0x290   :  { %v950_v27 = vmul.f32 0.5, %v859_v14 }
 0x292   :  { %v2492_v34 = vadd.f32 %v2472_v24, %v950_v27 }
 0x294   :  { %v999_v38 = vsel %vm992_vm5, %v2492_v34, -inf }
 0x295   :  { %v924_v19 = vpop.f32.mrf.mxu2 }
 0x296   :  { %v956_v21 = vmul.f32 0.5, %v924_v19 }
 0x297   :  { %v862_v23 = vpop.f32.mrf.mxu1 }
 0x298   :  { %v2487_v25 = vadd.f32 %v2484_v17, %v956_v21  ;;  %v951_v36 = vmul.f32 0.5, %v862_v23 }
 0x29a   :  { %v1017_v29 = vsel %vm992_vm5, %v2487_v25, -inf  ;;  %v2505_v44 = vadd.f32 %v2472_v24, %v951_v36 }
 0x29b   :  { %1018 = vmax.xlane.f32.xlu1 %v1017_v29 }
 0x29c   :  { %v1002_v46 = vsel %vm992_vm5, %v2505_v44, -inf }
 0x29d   :  { %v927_v31 = vpop.f32.mrf.mxu2 }
 0x29e   :  { %v957_v33 = vmul.f32 0.5, %v927_v31 }
 0x29f   :  { %v865_v20 = vpop.f32.mrf.mxu1 }
 0x2a0   :  { %v2495_v35 = vadd.f32 %v2484_v17, %v957_v33  ;;  %v952_v37 = vmul.f32 0.5, %v865_v20 }
 0x2a2   :  { %v1020_v39 = vsel %vm992_vm5, %v2495_v35, -inf  ;;  %v2502_v43 = vadd.f32 %v2472_v24, %v952_v37 }
 0x2a3   :  { %1000 = vmax.xlane.f32.xlu1 %v999_v38  ;;  %1021 = vmax.xlane.f32.xlu2 %v1020_v39 }
 0x2a4   :  { %v1005_v15 = vsel %vm992_vm5, %v2502_v43, -inf }
 0x2a5   :  { %v930_v41 = vpop.f32.mrf.mxu2 }
 0x2a6   :  { %v958_v40 = vmul.f32 0.5, %v930_v41 }
 0x2a7   :  { %v868_v45 = vpop.f32.mrf.mxu1 }
 0x2a8   :  { %v2508_v26 = vadd.f32 %v2484_v17, %v958_v40  ;;  %v953_v47 = vmul.f32 0.5, %v868_v45 }
 0x2aa   :  { %v1023_v30 = vsel %vm992_vm5, %v2508_v26, -inf  ;;  %v2517_v52 = vadd.f32 %v2472_v24, %v953_v47 }
 0x2ab   :  { %1006 = vmax.xlane.f32.xlu1 %v1005_v15  ;;  %1003 = vmax.xlane.f32.xlu2 %v1002_v46 }
 0x2ac   :  { %1024 = vmax.xlane.f32.xlu0 %v1023_v30  ;;  %v1008_v58 = vsel %vm992_vm5, %v2517_v52, -inf }
 0x2ad   :  { %v933_v48 = vpop.f32.mrf.mxu2 }
 0x2ae   :  { %v959_v49 = vmul.f32 0.5, %v933_v48 }
 0x2af   :  { %v871_v51 = vpop.f32.mrf.mxu1 }
 0x2b0   :  { %v2520_v54 = vadd.f32 %v2484_v17, %v959_v49  ;;  %v954_v55 = vmul.f32 0.5, %v871_v51 }
 0x2b2   :  { %v1026_v57 = vsel %vm992_vm5, %v2520_v54, -inf  ;;  %v2527_v62 = vadd.f32 %v2472_v24, %v954_v55 }
 0x2b3   :  { %1027 = vmax.xlane.f32.xlu2 %v1026_v57 }
 0x2b4   :  { %1009 = vmax.xlane.f32.xlu0 %v1008_v58  ;;  %v1011_v2 = vsel %vm992_vm5, %v2527_v62, -inf }
 0x2b5   :  { %v936_v60 = vpop.f32.mrf.mxu2 }
 0x2b6   :  { %v960_v61 = vmul.f32 0.5, %v936_v60 }
 0x2b7   :  { %v874_v63 = vpop.f32.mrf.mxu1 }
 0x2b8   :  { %v2530_v0 = vadd.f32 %v2484_v17, %v960_v61  ;;  %v955_v1 = vmul.f32 0.5, %v874_v63 }
 0x2ba   :  { %v1029_v3 = vsel %vm992_vm5, %v2530_v0, -inf  ;;  %v2537_v28 = vadd.f32 %v2472_v24, %v955_v1 }
 0x2bb   :  { %1012 = vmax.xlane.f32.xlu2 %v1011_v2  ;;  %1030 = vmax.xlane.f32.xlu1 %v1029_v3 }
 0x2bc   :  { %v1014_v8 = vsel %vm992_vm5, %v2537_v28, -inf }
 0x2bd   :  { %v939_v4 = vpop.f32.mrf.mxu2 }
 0x2be   :  { %v961_v5 = vmul.f32 0.5, %v939_v4 }
 0x2c0   :  { %v2540_v7 = vadd.f32 %v2484_v17, %v961_v5 }
 0x2c2   :  { %v1032_v9 = vsel %vm992_vm5, %v2540_v7, -inf }
 0x2c3   :  { %1015 = vmax.xlane.f32.xlu2 %v1014_v8  ;;  %1033 = vmax.xlane.f32.xlu1 %v1032_v9 }
 0x2c5   :  { %v942_v10 = vpop.f32.mrf.mxu2 }
 0x2c6   :  { %v962_v12 = vmul.f32 0.5, %v942_v10 }
 0x2c8   :  { %v2547_v13 = vadd.f32 %v2484_v17, %v962_v12 }
 0x2ca   :  { %v1035_v24 = vsel %vm992_vm5, %v2547_v13, -inf }
 0x2cb   :  { %1036 = vmax.xlane.f32.xlu1 %v1035_v24 }
 0x2cd   :  { %v945_v14 = vpop.f32.mrf.mxu2 }
 0x2ce   :  { %v963_v16 = vmul.f32 0.5, %v945_v14 }
 0x2d0   :  { %v2552_v19 = vadd.f32 %v2484_v17, %v963_v16 }
 0x2d2   :  { %v1038_v21 = vsel %vm992_vm5, %v2552_v19, -inf }
 0x2d3   :  { %1039 = vmax.xlane.f32.xlu1 %v1038_v21 }
 0x2f8   :  { %v995_v23 = vpop.xlane.xlu0 %994 }
 0x2f9   :  { %v1041_v27 = vsub.f32 %v2475_v6, %v995_v23 }
 0x2fb   :  { %v1057_v29 = vmul.f32 1.442695, %v1041_v27 }
 0x2fd   :  { %1730 = vpow2.f32 %v1057_v29 }
 0x300   :  { %v998_v31 = vpop.xlane.xlu0 %997 }
 0x301   :  { %v1042_v33 = vsub.f32 %v2480_v11, %v998_v31 }
 0x303   :  { %v2558_v20 = vpop.eup %1730  ;;  %v1059_v36 = vmul.f32 1.442695, %v1042_v33 }
 0x304   :  { %v1089_v37 = vsel %vm992_vm5, %v2558_v20, 0.0 }
 0x305   :  { %1732 = vpow2.f32 %v1059_v36  ;;  %1090 = vadd.xlane.f32.xlu0 %v1089_v37 }
 0x30b   :  { %v2562_v17 = vpop.eup %1732 }
 0x30c   :  { %v1092_v38 = vsel %vm992_vm5, %v2562_v17, 0.0 }
 0x30d   :  { %1093 = vadd.xlane.f32.xlu0 %v1092_v38 }
 0x30e   :  { %v1019_v6 = vpop.xlane.xlu1 %1018 }
 0x30f   :  { %v1049_v39 = vsub.f32 %v2487_v25, %v1019_v6 }
 0x311   :  { %v1073_v41 = vmul.f32 1.442695, %v1049_v39 }
 0x313   :  { %1734 = vpow2.f32 %v1073_v41 }
 0x316   :  { %v1001_v11 = vpop.xlane.xlu1 %1000  ;;  %v1022_v40 = vpop.xlane.xlu2 %1021 }
 0x317   :  { %v1043_v45 = vsub.f32 %v2492_v34, %v1001_v11  ;;  %v1050_v15 = vsub.f32 %v2495_v35, %v1022_v40 }
 0x319   :  { %v2569_v46 = vpop.eup %1734  ;;  %v1061_v30 = vmul.f32 1.442695, %v1043_v45  ;;  %v1075_v47 = vmul.f32 1.442695, %v1050_v15 }
 0x31a   :  { %v1113_v48 = vsel %vm992_vm5, %v2569_v46, 0.0 }
 0x31b   :  { %1736 = vpow2.f32 %v1061_v30  ;;  %1114 = vadd.xlane.f32.xlu2 %v1113_v48 }
 0x31c   :  { %1738 = vpow2.f32 %v1075_v47 }
 0x31e   :  { %v1007_v49 = vpop.xlane.xlu1 %1006  ;;  %v1004_v25 = vpop.xlane.xlu2 %1003 }
 0x31f   :  { %v1045_v51 = vsub.f32 %v2502_v43, %v1007_v49  ;;  %v1044_v55 = vsub.f32 %v2505_v44, %v1004_v25  ;;  %v1025_v57 = vpop.xlane.xlu0 %1024 }
 0x320   :  { %v1051_v34 = vsub.f32 %v2508_v26, %v1025_v57 }
 0x321   :  { %v2576_v35 = vpop.eup %1736  ;;  %v1065_v58 = vmul.f32 1.442695, %v1045_v51  ;;  %v1063_v60 = vmul.f32 1.442695, %v1044_v55 }
 0x322   :  { %v2578_v61 = vpop.eup %1738  ;;  %v1077_v63 = vmul.f32 1.442695, %v1051_v34  ;;  %v1095_v1 = vsel %vm992_vm5, %v2576_v35, 0.0 }
 0x323   :  { %1740 = vpow2.f32 %v1065_v58  ;;  %1096 = vadd.xlane.f32.xlu0 %v1095_v1  ;;  %v1116_v43 = vsel %vm992_vm5, %v2578_v61, 0.0 }
 0x324   :  { %1742 = vpow2.f32 %v1063_v60  ;;  %1117 = vadd.xlane.f32.xlu2 %v1116_v43 }
 0x325   :  { %1744 = vpow2.f32 %v1077_v63 }
 0x326   :  { %v1028_v44 = vpop.xlane.xlu2 %1027 }
 0x327   :  { %v1010_v26 = vpop.xlane.xlu0 %1009  ;;  %v1052_v2 = vsub.f32 %v2520_v54, %v1028_v44 }
 0x328   :  { %v1046_v3 = vsub.f32 %v2517_v52, %v1010_v26 }
 0x329   :  { %v2586_v4 = vpop.eup %1740  ;;  %v1079_v5 = vmul.f32 1.442695, %v1052_v2 }
 0x32a   :  { %v2588_v8 = vpop.eup %1742  ;;  %v1067_v9 = vmul.f32 1.442695, %v1046_v3  ;;  %v1101_v10 = vsel %vm992_vm5, %v2586_v4, 0.0 }
 0x32b   :  { %v2592_v12 = vpop.eup %1744  ;;  %1746 = vpow2.f32 %v1079_v5  ;;  %v1098_v24 = vsel %vm992_vm5, %v2588_v8, 0.0 }
 0x32c   :  { %1748 = vpow2.f32 %v1067_v9  ;;  %1099 = vadd.xlane.f32.xlu0 %v1098_v24  ;;  %1102 = vadd.xlane.f32.xlu2 %v1101_v10  ;;  %v1119_v52 = vsel %vm992_vm5, %v2592_v12, 0.0 }
 0x32d   :  { %1120 = vadd.xlane.f32.xlu1 %v1119_v52 }
 0x32e   :  { %v1013_v54 = vpop.xlane.xlu2 %1012  ;;  %v1031_v14 = vpop.xlane.xlu1 %1030 }
 0x32f   :  { %v1047_v16 = vsub.f32 %v2527_v62, %v1013_v54  ;;  %v1053_v21 = vsub.f32 %v2530_v0, %v1031_v14 }
 0x331   :  { %v2600_v23 = vpop.eup %1746  ;;  %v1069_v27 = vmul.f32 1.442695, %v1047_v16  ;;  %v1081_v29 = vmul.f32 1.442695, %v1053_v21 }
 0x332   :  { %v2602_v31 = vpop.eup %1748  ;;  %v1122_v33 = vsel %vm992_vm5, %v2600_v23, 0.0 }
 0x333   :  { %1750 = vpow2.f32 %v1069_v27  ;;  %v1104_v36 = vsel %vm992_vm5, %v2602_v31, 0.0 }
 0x334   :  { %1752 = vpow2.f32 %v1081_v29  ;;  %1123 = vadd.xlane.f32.xlu0 %v1122_v33 }
 0x335   :  { %1105 = vadd.xlane.f32.xlu1 %v1104_v36 }
 0x336   :  { %v1016_v37 = vpop.xlane.xlu2 %1015  ;;  %v1034_v62 = vpop.xlane.xlu1 %1033 }
 0x337   :  { %v1048_v0 = vsub.f32 %v2537_v28, %v1016_v37  ;;  %v1054_v38 = vsub.f32 %v2540_v7, %v1034_v62 }
 0x339   :  { %v2610_v6 = vpop.eup %1750  ;;  %v1071_v39 = vmul.f32 1.442695, %v1048_v0  ;;  %v1083_v41 = vmul.f32 1.442695, %v1054_v38 }
 0x33a   :  { %v2612_v11 = vpop.eup %1752  ;;  %v1107_v40 = vsel %vm992_vm5, %v2610_v6, 0.0 }
 0x33b   :  { %1754 = vpow2.f32 %v1071_v39  ;;  %v1125_v45 = vsel %vm992_vm5, %v2612_v11, 0.0 }
 0x33c   :  { %1756 = vpow2.f32 %v1083_v41  ;;  %1108 = vadd.xlane.f32.xlu0 %v1107_v40  ;;  %1126 = vadd.xlane.f32.xlu2 %v1125_v45 }
 0x33e   :  { %v1037_v15 = vpop.xlane.xlu1 %1036 }
 0x33f   :  { %v1055_v28 = vsub.f32 %v2547_v13, %v1037_v15 }
 0x341   :  { %v2619_v7 = vpop.eup %1754  ;;  %v1085_v30 = vmul.f32 1.442695, %v1055_v28 }
 0x342   :  { %v2621_v47 = vpop.eup %1756  ;;  %v1110_v48 = vsel %vm992_vm5, %v2619_v7, 0.0 }
 0x343   :  { %1758 = vpow2.f32 %v1085_v30  ;;  %v1128_v49 = vsel %vm992_vm5, %v2621_v47, 0.0 }
 0x344   :  { %1111 = vadd.xlane.f32.xlu2 %v1110_v48  ;;  %1129 = vadd.xlane.f32.xlu1 %v1128_v49 }
 0x346   :  { %v1040_v25 = vpop.xlane.xlu1 %1039 }
 0x347   :  { %v1056_v51 = vsub.f32 %v2552_v19, %v1040_v25 }
 0x349   :  { %v2628_v55 = vpop.eup %1758  ;;  %v1087_v13 = vmul.f32 1.442695, %v1056_v51 }
 0x34a   :  { %v1131_v57 = vsel %vm992_vm5, %v2628_v55, 0.0 }
 0x34b   :  { %1760 = vpow2.f32 %v1087_v13  ;;  %1132 = vadd.xlane.f32.xlu0 %v1131_v57 }
 0x351   :  { %v2632_v34 = vpop.eup %1760 }
 0x352   :  { %v1134_v58 = vsel %vm992_vm5, %v2632_v34, 0.0 }
 0x353   :  { %1135 = vadd.xlane.f32.xlu1 %v1134_v58  ;;  %v1347_v58 = vld [vmem:[#allocation13 + $0x10] sm:$0xff] }
 0x378   :  { %v1091_v60 = vpop.xlane.xlu0 %1090 }
 0x379   :  { %1762 = vrcp.f32 %v1091_v60 }
 0x37f   :  { %v1763_v63 = vpop.eup %1762 }
 0x380   :  { %v1153_v1 = vmul.f32 %v1763_v63, %v2558_v20  ;;  %v1094_v19 = vpop.xlane.xlu0 %1093 }
 0x381   :  { %1764 = vrcp.f32 %v1094_v19 }
 0x382   :  { %1662 = vmatmul.msk.f32.vlgmr.msrb.gmra.mxu3 %vm992_vm5, %v1153_v1  ;;  %v1346_v1 = vld [vmem:[#allocation13 + $0x8] sm:$0xff] }
 0x387   :  { %v1765_v43 = vpop.eup %1764 }
 0x388   :  { %v1154_v44 = vmul.f32 %v1765_v43, %v2562_v17  ;;  %v1345_v43 = vld [vmem:[#allocation13] sm:$0xff] }
 0x38a   :  { %1663 = vmatmul.msk.f32.gmra.mxu3 %vm992_vm5, %v1154_v44 }
 0x38e   :  { %v1115_v26 = vpop.xlane.xlu2 %1114 }
 0x38f   :  { %1766 = vrcp.f32 %v1115_v26 }
 0x395   :  { %v1767_v2 = vpop.eup %1766 }
 0x396   :  { %v1161_v3 = vmul.f32 %v1767_v2, %v2569_v46  ;;  %v1097_v5 = vpop.xlane.xlu0 %1096 }
 0x397   :  { %1768 = vrcp.f32 %v1097_v5  ;;  %v1118_v9 = vpop.xlane.xlu2 %1117 }
 0x398   :  { %1770 = vrcp.f32 %v1118_v9  ;;  %1670 = vmatmul.msk.f32.vlgmr.msra.gmra.mxu0 %vm992_vm5, %v1161_v3 }
 0x39d   :  { %v1769_v20 = vpop.eup %1768 }
 0x39e   :  { %v1771_v10 = vpop.eup %1770  ;;  %v1155_v24 = vmul.f32 %v1769_v20, %v2576_v35 }
 0x39f   :  { %v1100_v52 = vpop.xlane.xlu0 %1099  ;;  %v1162_v17 = vmul.f32 %v1771_v10, %v2578_v61  ;;  %v1103_v46 = vpop.xlane.xlu2 %1102 }
 0x3a0   :  { %1772 = vrcp.f32 %v1100_v52  ;;  %v1121_v54 = vpop.xlane.xlu1 %1120  ;;  %1664 = vmatmul.msk.f32.gmra.mxu3 %vm992_vm5, %v1155_v24 }
 0x3a1   :  { %1671 = vmatmul.msk.f32.gmra.mxu0 %vm992_vm5, %v1162_v17  ;;  %1774 = vrcp.f32 %v1121_v54 }
 0x3a2   :  { %1776 = vrcp.f32 %v1103_v46 }
 0x3a6   :  { %v1773_v14 = vpop.eup %1772 }
 0x3a7   :  { %v1124_v16 = vpop.xlane.xlu0 %1123  ;;  %v1156_v21 = vmul.f32 %v1773_v14, %v2588_v8  ;;  %v1775_v27 = vpop.eup %1774 }
 0x3a8   :  { %1778 = vrcp.f32 %v1124_v16  ;;  %v1163_v35 = vmul.f32 %v1775_v27, %v2592_v12  ;;  %v1106_v61 = vpop.xlane.xlu1 %1105  ;;  %v1777_v29 = vpop.eup %1776 }
 0x3a9   :  { %1665 = vmatmul.msk.f32.gmra.mxu3 %vm992_vm5, %v1156_v21  ;;  %1780 = vrcp.f32 %v1106_v61  ;;  %v1157_v37 = vmul.f32 %v1777_v29, %v2586_v4 }
 0x3aa   :  { %1672 = vmatmul.msk.f32.gmra.mxu0 %vm992_vm5, %v1163_v35 }
 0x3ae   :  { %v1779_v33 = vpop.eup %1778 }
 0x3af   :  { %v1127_v36 = vpop.xlane.xlu2 %1126  ;;  %v1164_v62 = vmul.f32 %v1779_v33, %v2600_v23  ;;  %v1109_v8 = vpop.xlane.xlu0 %1108 }
 0x3b0   :  { %1782 = vrcp.f32 %v1127_v36  ;;  %v1781_v0 = vpop.eup %1780 }
 0x3b1   :  { %1666 = vmatmul.msk.f32.gmra.mxu3 %vm992_vm5, %v1157_v37  ;;  %1784 = vrcp.f32 %v1109_v8  ;;  %v1158_v39 = vmul.f32 %v1781_v0, %v2602_v31 }
 0x3b2   :  { %1673 = vmatmul.msk.f32.gmra.mxu0 %vm992_vm5, %v1164_v62 }
 0x3b6   :  { %v1783_v12 = vpop.eup %1782 }
 0x3b7   :  { %v1130_v38 = vpop.xlane.xlu1 %1129  ;;  %v1165_v41 = vmul.f32 %v1783_v12, %v2612_v11  ;;  %v1112_v4 = vpop.xlane.xlu2 %1111 }
 0x3b8   :  { %1786 = vrcp.f32 %v1130_v38  ;;  %v1785_v23 = vpop.eup %1784 }
 0x3b9   :  { %1667 = vmatmul.msk.f32.gmra.mxu3 %vm992_vm5, %v1158_v39  ;;  %1788 = vrcp.f32 %v1112_v4  ;;  %v1159_v15 = vmul.f32 %v1785_v23, %v2610_v6 }
 0x3ba   :  { %1674 = vmatmul.msk.f32.gmra.mxu0 %vm992_vm5, %v1165_v41 }
 0x3be   :  { %v1133_v40 = vpop.xlane.xlu0 %1132  ;;  %v1787_v45 = vpop.eup %1786 }
 0x3bf   :  { %1790 = vrcp.f32 %v1133_v40  ;;  %v1166_v28 = vmul.f32 %v1787_v45, %v2621_v47  ;;  %v1789_v31 = vpop.eup %1788  ;;  %v1348_v47 = vld [vmem:[#allocation13 + $0x18] sm:$0xff] }
 0x3c0   :  { %v1160_v48 = vmul.f32 %v1789_v31, %v2619_v7  ;;  %1371 = vmatpush.msrb.mxu1 %v1348_v47 }
 0x3c1   :  { %1668 = vmatmul.msk.f32.gmra.mxu3 %vm992_vm5, %v1159_v15 }
 0x3c2   :  { %1675 = vmatmul.msk.f32.gmra.mxu0 %vm992_vm5, %v1166_v28  ;;  %1372 = vmatpush.msrb.mxu1 %v1347_v58 }
 0x3c4   :  { %1373 = vmatpush.msrb.mxu1 %v1346_v1 }
 0x3c5   :  { %v1791_v11 = vpop.eup %1790 }
 0x3c6   :  { %v1136_v30 = vpop.xlane.xlu1 %1135  ;;  %v1167_v49 = vmul.f32 %v1791_v11, %v2628_v55  ;;  %1374 = vmatpush.msrb.mxu1 %v1345_v43 }
 0x3c7   :  { %1792 = vrcp.f32 %v1136_v30 }
 0x3c9   :  { %1669 = vmatmul.msk.f32.gmra.mxu3 %vm992_vm5, %v1160_v48 }
 0x3ca   :  { %1676 = vmatmul.msk.f32.gmra.mxu0 %vm992_vm5, %v1167_v49 }
 0x3cd   :  { %v1793_v25 = vpop.eup %1792 }
 0x3ce   :  { %v1168_v6 = vmul.f32 %v1793_v25, %v2632_v34 }
 0x3d2   :  { %1677 = vmatmul.msk.f32.gmra.mxu0 %vm992_vm5, %v1168_v6 }
 0x405   :  { %v1210_v51 = vpop.f32.mrf.mxu3 }
 0x406   :  { %v1299_v3 = vmul.f32 %v2395_v18, %v1210_v51 }
 0x408   :  { %v1315_v24 = vsel %vm234_vm0, %v1299_v3, 0.0  ;;  %v1450_v3 = vld [vmem:[#allocation14 + $0x18] sm:$0xff] }
 0x409   :  { %1473 = vmatpush.msrb.mxu2 %v1450_v3 }
 0x40d   :  { %v1213_v57 = vpop.f32.mrf.mxu3 }
 0x40e   :  { %v1300_v2 = vmul.f32 %v2419_v42, %v1213_v57 }
 0x410   :  { %v1316_v20 = vsel %vm234_vm0, %v1300_v2, 0.0 }
 0x411   :  { %v1317_v54 = vadd.f32 %v1316_v20, %v1315_v24 }
 0x415   :  { %v1275_v13 = vpop.f32.mrf.mxu0 }
 0x416   :  { %v1307_v35 = vmul.f32 %v2395_v18, %v1275_v13 }
 0x418   :  { %v1330_v12 = vsel %vm234_vm0, %v1307_v35, 0.0 }
 0x41e   :  { %v1278_v60 = vpop.f32.mrf.mxu0 }
 0x41f   :  { %v1308_v14 = vmul.f32 %v2419_v42, %v1278_v60 }
 0x421   :  { %v1331_v62 = vsel %vm234_vm0, %v1308_v14, 0.0 }
 0x422   :  { %v1332_v39 = vadd.f32 %v1331_v62, %v1330_v12 }
 0x423   :  { %v1216_v7 = vpop.f32.mrf.mxu3 }
 0x424   :  { %v1301_v5 = vmul.f32 %v2425_v32, %v1216_v7  ;;  %v1804_v7 = vld [vmem:[#allocation2] sm:$0xff] }
 0x426   :  { %v1318_v52 = vsel %vm234_vm0, %v1301_v5, 0.0 }
 0x427   :  { %v1281_v63 = vpop.f32.mrf.mxu0  ;;  %v1319_v27 = vadd.f32 %v1318_v52, %v1317_v54 }
 0x428   :  { %v1309_v61 = vmul.f32 %v2425_v32, %v1281_v63 }
 0x42a   :  { %v1333_v38 = vsel %vm234_vm0, %v1309_v61, 0.0  ;;  %v1449_v61 = vld [vmem:[#allocation14 + $0x10] sm:$0xff] }
 0x42b   :  { %v1334_v45 = vadd.f32 %v1333_v38, %v1332_v39  ;;  %1474 = vmatpush.msrb.mxu2 %v1449_v61 }
 0x42c   :  { %v1219_v55 = vpop.f32.mrf.mxu3 }
 0x42d   :  { %v1302_v10 = vmul.f32 %v2433_v50, %v1219_v55 }
 0x42f   :  { %v1284_v19 = vpop.f32.mrf.mxu0  ;;  %v1320_v16 = vsel %vm234_vm0, %v1302_v10, 0.0 }
 0x430   :  { %v1321_v36 = vadd.f32 %v1320_v16, %v1319_v27  ;;  %v1310_v8 = vmul.f32 %v2433_v50, %v1284_v19  ;;  %v1805_v19 = vld [vmem:[#allocation2 + $0x8] sm:$0xff] }
 0x432   :  { %v1335_v23 = vsel %vm234_vm0, %v1310_v8, 0.0  ;;  %v1489_v8 = vld [vmem:[#allocation16 + $0x18] sm:$0xff] }
 0x433   :  { %1512 = vmatpush.msra.mxu3 %v1489_v8 }
 0x434   :  { %v1222_v44 = vpop.f32.mrf.mxu3 }
 0x435   :  { %v1303_v17 = vmul.f32 %v2440_v53, %v1222_v44 }
 0x437   :  { %v1287_v34 = vpop.f32.mrf.mxu0  ;;  %v1322_v29 = vsel %vm234_vm0, %v1303_v17, 0.0 }
 0x438   :  { %v1323_v0 = vadd.f32 %v1322_v29, %v1321_v36  ;;  %v1311_v18 = vmul.f32 %v2440_v53, %v1287_v34  ;;  %v1336_v53 = vadd.f32 %v1335_v23, %v1334_v45  ;;  %v2071_v34 = vmov 32.0   ;;  %v1448_v29 = vld [vmem:[#allocation14 + $0x8] sm:$0xff] }
 0x439   :  { %1794 = vrcp.f32 %v2071_v34  ;;  %1475 = vmatpush.msrb.mxu2 %v1448_v29 }
 0x43a   :  { %v1337_v28 = vsel %vm234_vm0, %v1311_v18, 0.0 }
 0x43b   :  { %v1338_v6 = vadd.f32 %v1337_v28, %v1336_v53  ;;  %v1713_v53 = vld [vmem:[%s2772_s19] ss:$0 sm:$0xff] }
 0x43c   :  { %v1225_v26 = vpop.f32.mrf.mxu3 }
 0x43d   :  { %v1304_v21 = vmul.f32 %v2447_v56, %v1225_v26 }
 0x43f   :  { %v1290_v9 = vpop.f32.mrf.mxu0  ;;  %v1324_v42 = vsel %vm234_vm0, %v1304_v21, 0.0  ;;  %v1795_v26 = vpop.eup %1794 }
 0x440   :  { %v1325_v41 = vadd.f32 %v1324_v42, %v1323_v0  ;;  %v1312_v40 = vmul.f32 %v2447_v56, %v1290_v9  ;;  %v1393_v2 = vmul.f32 32.0, %v1795_v26  ;;  %vm1397_vm6 = vweird.f32 %v1795_v26  ;;  %v1488_v42 = vld [vmem:[#allocation16 + $0x10] sm:$0xff]  ;;  %v1487_v0 = vld [vmem:[#allocation16 + $0x8] sm:$0xff] }
 0x441   :  { %1513 = vmatpush.msra.mxu3 %v1488_v42 }
 0x442   :  { %v1339_v49 = vsel %vm234_vm0, %v1312_v40, 0.0  ;;  %v1394_v5 = vsub.f32 1.0, %v1393_v2 }
 0x443   :  { %v1340_v47 = vadd.f32 %v1339_v49, %v1338_v6  ;;  %1514 = vmatpush.msra.mxu3 %v1487_v0 }
 0x444   :  { %v1228_v46 = vpop.f32.mrf.mxu3  ;;  %v1395_v9 = vmul.f32 %v1795_v26, %v1394_v5 }
 0x445   :  { %v1305_v33 = vmul.f32 %v2454_v59, %v1228_v46 }
 0x446   :  { %v1396_v20 = vadd.f32 %v1795_v26, %v1395_v9 }
 0x447   :  { %v1293_v37 = vpop.f32.mrf.mxu0  ;;  %v1326_v32 = vsel %vm234_vm0, %v1305_v33, 0.0  ;;  %v1447_v33 = vld [vmem:[#allocation14] sm:$0xff] }
 0x448   :  { %v1327_v15 = vadd.f32 %v1326_v32, %v1325_v41  ;;  %v1313_v31 = vmul.f32 %v2454_v59, %v1293_v37  ;;  %v1711_v59 = vld [vmem:[%s2770_s17] ss:$0 sm:$0xff]  ;;  %v2707_v10 = vsel %vm1397_vm6, %v1795_v26, %v1396_v20  ;;  %1476 = vmatpush.msrb.mxu2 %v1447_v33 }
 0x44a   :  { %v1341_v56 = vsel %vm234_vm0, %v1313_v31, 0.0 }
 0x44b   :  { %v1342_v13 = vadd.f32 %v1341_v56, %v1340_v47 }
 0x44c   :  { %v1231_v4 = vpop.f32.mrf.mxu3 }
 0x44d   :  { %v1306_v50 = vmul.f32 %v2461_v22, %v1231_v4 }
 0x44f   :  { %v1328_v11 = vsel %vm234_vm0, %v1306_v50, 0.0  ;;  %v1296_v48 = vpop.f32.mrf.mxu0 }
 0x450   :  { %v1329_v30 = vadd.f32 %v1328_v11, %v1327_v15  ;;  %v1314_v25 = vmul.f32 %v2461_v22, %v1296_v48  ;;  %v1712_v15 = vld [vmem:[%s2771_s18] ss:$0 sm:$0xff] }
 0x452   :  { %1678 = vmatmul.msk.f32.vlgmr.msrb.gmra.mxu1 %vm234_vm0, %v1329_v30  ;;  %v1343_v51 = vsel %vm234_vm0, %v1314_v25, 0.0 }
 0x453   :  { %v1344_v57 = vadd.f32 %v1343_v51, %v1342_v13 }
 0x45a   :  { %1679 = vmatmul.msk.f32.gmra.mxu1 %vm234_vm0, %v1344_v57  ;;  %v1486_v57 = vld [vmem:[#allocation16] sm:$0xff] }
 0x45b   :  { %1515 = vmatpush.msra.mxu3 %v1486_v57 }
 0x4cf   :  { %v1376_v58 = vpop.f32.mrf.mxu1 }
 0x4d0   :  { %v1377_v60 = vadd.f32 %v1711_v59, %v1376_v58 }
 0x4d2   :  { %v1382_v22 = vadd.f32 %v1804_v7, %v1377_v60 }
 0x4d4   :  { %v1386_v63 = vsel %vm234_vm0, %v1382_v22, 0.0 }
 0x4d5   :  { %1387 = vadd.xlane.f32.xlu2 %v1386_v63 }
 0x4d7   :  { %v1379_v55 = vpop.f32.mrf.mxu1 }
 0x4d8   :  { %v1380_v1 = vadd.f32 %v1711_v59, %v1379_v55  ;;  %v1714_v59 = vld [vmem:[%s2774_s21] ss:$0 sm:$0xff] }
 0x4da   :  { %v1383_v43 = vadd.f32 %v1805_v19, %v1380_v1  ;;  %v1715_v1 = vld [vmem:[%s2776_s23] ss:$0 sm:$0xff] }
 0x4dc   :  { %v1389_v44 = vsel %vm234_vm0, %v1383_v43, 0.0 }
 0x4dd   :  { %1390 = vadd.xlane.f32.xlu0 %v1389_v44 }
 0x548   :  { %v1388_v24 = vpop.xlane.xlu2 %1387 }
 0x549   :  { %v1399_v52 = vmul.f32 %v2707_v10, %v1388_v24 }
 0x54b   :  { %v1401_v17 = vsub.f32 %v1382_v22, %v1399_v52 }
 0x54d   :  { %v1403_v54 = vmul.f32 %v1401_v17, %v1401_v17 }
 0x54f   :  { %v1405_v46 = vsel %vm234_vm0, %v1403_v54, 0.0 }
 0x550   :  { %1406 = vadd.xlane.f32.xlu1 %v1405_v46  ;;  %v1391_v14 = vpop.xlane.xlu0 %1390 }
 0x551   :  { %v1400_v16 = vmul.f32 %v2707_v10, %v1391_v14 }
 0x553   :  { %v1402_v21 = vsub.f32 %v1383_v43, %v1400_v16 }
 0x555   :  { %v1404_v27 = vmul.f32 %v1402_v21, %v1402_v21 }
 0x557   :  { %v1408_v35 = vsel %vm234_vm0, %v1404_v27, 0.0 }
 0x558   :  { %1409 = vadd.xlane.f32.xlu2 %v1408_v35 }
 0x5c3   :  { %v1407_v36 = vpop.xlane.xlu1 %1406 }
 0x5c4   :  { %v1411_v37 = vmul.f32 %v1407_v36, %v2707_v10 }
 0x5c6   :  { %v1413_v62 = vadd.f32 1e-05, %v1411_v37 }
 0x5c8   :  { %1796 = vrsqrt.f32 %v1413_v62  ;;  %vm1421_vm8 = vweird.f32 %v1413_v62 }
 0x5cb   :  { %v1410_v12 = vpop.xlane.xlu2 %1409 }
 0x5cc   :  { %v1412_v38 = vmul.f32 %v1410_v12, %v2707_v10 }
 0x5ce   :  { %v1797_v18 = vpop.eup %1796  ;;  %v1414_v32 = vadd.f32 1e-05, %v1412_v38 }
 0x5cf   :  { %v1416_v39 = vmul.f32 %v1797_v18, %v1413_v62  ;;  %vm1422_vm7 = vweird.f32 %v1797_v18 }
 0x5d0   :  { %1798 = vrsqrt.f32 %v1414_v32  ;;  %vm1423_vm9 = vmor %vm1421_vm8, %vm1422_vm7  ;;  %vm1431_vm11 = vweird.f32 %v1414_v32 }
 0x5d1   :  { %v1417_v41 = vmul.f32 %v1797_v18, %v1416_v39 }
 0x5d3   :  { %v1418_v4 = vmul.f32 0.5, %v1417_v41 }
 0x5d5   :  { %v1419_v23 = vsub.f32 1.5, %v1418_v4  ;;  %v1717_v4 = vld [vmem:[%s2778_s25] ss:$0 sm:$0xff] }
 0x5d6   :  { %v1799_v40 = vpop.eup %1798 }
 0x5d7   :  { %v1420_v50 = vmul.f32 %v1797_v18, %v1419_v23  ;;  %v1426_v45 = vmul.f32 %v1799_v40, %v1414_v32  ;;  %vm1432_vm10 = vweird.f32 %v1799_v40  ;;  %v1716_v32 = vld [vmem:[%s2777_s24] ss:$0 sm:$0xff]  ;;  %s2072_s24 = smov [#allocation17]  }
 0x5d8   :  { %vm1433_vm12 = vmor %vm1431_vm11, %vm1432_vm10  ;;  %s1587_s16 = sshll.u32 %s2072_s24, 4  ;;  %s1588_s16 = int_to_ptr.vmem [resolvable:$true] %s1587_s16 }
 0x5d9   :  { %v1424_v28 = vsel %vm1423_vm9, %v1797_v18, %v1420_v50  ;;  %v1427_v31 = vmul.f32 %v1799_v40, %v1426_v45 }
 0x5da   :  { %v1435_v11 = vmul.f32 %v1424_v28, %v1401_v17 }
 0x5db   :  { %v1428_v30 = vmul.f32 0.5, %v1427_v31 }
 0x5dc   :  { %v1440_v48 = vmul.f32 %v1712_v15, %v1435_v11 }
 0x5dd   :  { %v1429_v49 = vsub.f32 1.5, %v1428_v30 }
 0x5de   :  { %v1445_v25 = vadd.f32 %v1713_v53, %v1440_v48 }
 0x5df   :  { %v1430_v6 = vmul.f32 %v1799_v40, %v1429_v49 }
 0x5e0   :  { %1680 = vmatmul.msk.f32.vlgmr.msrb.gmra.mxu2 %vm234_vm0, %v1445_v25 }
 0x5e1   :  { %v1434_v56 = vsel %vm1433_vm12, %v1799_v40, %v1430_v6 }
 0x5e2   :  { %v1436_v47 = vmul.f32 %v1434_v56, %v1402_v21 }
 0x5e4   :  { %v1441_v51 = vmul.f32 %v1712_v15, %v1436_v47 }
 0x5e6   :  { %v1446_v13 = vadd.f32 %v1713_v53, %v1441_v51 }
 0x5e8   :  { %1681 = vmatmul.msk.f32.gmra.mxu2 %vm234_vm0, %v1446_v13 }
 0x663   :  { %v1478_v58 = vpop.f32.mrf.mxu2 }
 0x664   :  { %v1479_v60 = vadd.f32 %v1714_v59, %v1478_v58 }
 0x666   :  { %v1484_v7 = vmax.f32 %v1479_v60, 0.0 }
 0x668   :  { %1682 = vmatmul.msk.f32.vlgmr.msra.gmra.mxu3 %vm234_vm0, %v1484_v7 }
 0x66b   :  { %v1481_v22 = vpop.f32.mrf.mxu2 }
 0x66c   :  { %v1482_v63 = vadd.f32 %v1714_v59, %v1481_v22 }
 0x66e   :  { %v1485_v55 = vmax.f32 %v1482_v63, 0.0 }
 0x670   :  { %1683 = vmatmul.msk.f32.gmra.mxu3 %vm234_vm0, %v1485_v55 }
 0x6eb   :  { %v1517_v19 = vpop.f32.mrf.mxu3 }
 0x6ec   :  { %v1518_v43 = vadd.f32 %v1715_v1, %v1517_v19 }
 0x6ee   :  { %v1523_v44 = vadd.f32 %v1518_v43, %v1445_v25 }
 0x6f0   :  { %v1527_v34 = vsel %vm234_vm0, %v1523_v44, 0.0 }
 0x6f1   :  { %1528 = vadd.xlane.f32.xlu0 %v1527_v34 }
 0x6f3   :  { %v1520_v26 = vpop.f32.mrf.mxu3 }
 0x6f4   :  { %v1521_v2 = vadd.f32 %v1715_v1, %v1520_v26 }
 0x6f6   :  { %v1524_v3 = vadd.f32 %v1521_v2, %v1446_v13 }
 0x6f8   :  { %v1530_v5 = vsel %vm234_vm0, %v1524_v3, 0.0 }
 0x6f9   :  { %1531 = vadd.xlane.f32.xlu1 %v1530_v5 }
 0x764   :  { %v1529_v9 = vpop.xlane.xlu0 %1528 }
 0x765   :  { %v1533_v20 = vmul.f32 %v1529_v9, %v2707_v10 }
 0x767   :  { %v1535_v24 = vsub.f32 %v1523_v44, %v1533_v20 }
 0x769   :  { %v1537_v52 = vmul.f32 %v1535_v24, %v1535_v24 }
 0x76b   :  { %v1539_v17 = vsel %vm234_vm0, %v1537_v52, 0.0 }
 0x76c   :  { %v1532_v54 = vpop.xlane.xlu1 %1531  ;;  %1540 = vadd.xlane.f32.xlu2 %v1539_v17 }
 0x76d   :  { %v1534_v46 = vmul.f32 %v1532_v54, %v2707_v10 }
 0x76f   :  { %v1536_v14 = vsub.f32 %v1524_v3, %v1534_v46 }
 0x771   :  { %v1538_v16 = vmul.f32 %v1536_v14, %v1536_v14 }
 0x773   :  { %v1542_v21 = vsel %vm234_vm0, %v1538_v16, 0.0 }
 0x774   :  { %1543 = vadd.xlane.f32.xlu0 %v1542_v21 }
 0x7df   :  { %v1541_v27 = vpop.xlane.xlu2 %1540 }
 0x7e0   :  { %v1545_v35 = vmul.f32 %v1541_v27, %v2707_v10 }
 0x7e2   :  { %v1547_v61 = vadd.f32 1e-05, %v1545_v35 }
 0x7e4   :  { %1800 = vrsqrt.f32 %v1547_v61  ;;  %vm1555_vm14 = vweird.f32 %v1547_v61 }
 0x7e7   :  { %v1544_v29 = vpop.xlane.xlu0 %1543 }
 0x7e8   :  { %v1546_v33 = vmul.f32 %v1544_v29, %v2707_v10 }
 0x7ea   :  { %v1801_v36 = vpop.eup %1800  ;;  %v1548_v37 = vadd.f32 1e-05, %v1546_v33 }
 0x7eb   :  { %v1550_v62 = vmul.f32 %v1801_v36, %v1547_v61  ;;  %vm1556_vm13 = vweird.f32 %v1801_v36 }
 0x7ec   :  { %1802 = vrsqrt.f32 %v1548_v37  ;;  %vm1557_vm15 = vmor %vm1555_vm14, %vm1556_vm13  ;;  %vm1565_vm2 = vweird.f32 %v1548_v37 }
 0x7ed   :  { %v1551_v8 = vmul.f32 %v1801_v36, %v1550_v62 }
 0x7ef   :  { %v1552_v42 = vmul.f32 0.5, %v1551_v8 }
 0x7f1   :  { %v1553_v0 = vsub.f32 1.5, %v1552_v42 }
 0x7f2   :  { %v1803_v12 = vpop.eup %1802 }
 0x7f3   :  { %v1554_v38 = vmul.f32 %v1801_v36, %v1553_v0  ;;  %v1560_v18 = vmul.f32 %v1803_v12, %v1548_v37  ;;  %vm1566_vm1 = vweird.f32 %v1803_v12 }
 0x7f4   :  { %vm1567_vm3 = vmor %vm1565_vm2, %vm1566_vm1 }
 0x7f5   :  { %v1558_v39 = vsel %vm1557_vm15, %v1801_v36, %v1554_v38  ;;  %v1561_v41 = vmul.f32 %v1803_v12, %v1560_v18 }
 0x7f6   :  { %v1569_v10 = vmul.f32 %v1558_v39, %v1535_v24 }
 0x7f7   :  { %v1562_v23 = vmul.f32 0.5, %v1561_v41 }
 0x7f8   :  { %v1574_v40 = vmul.f32 %v1716_v32, %v1569_v10 }
 0x7f9   :  { %v1563_v50 = vsub.f32 1.5, %v1562_v23 }
 0x7fa   :  { %v1579_v45 = vadd.f32 %v1717_v4, %v1574_v40 }
 0x7fb   :  { %v1564_v15 = vmul.f32 %v1803_v12, %v1563_v50 }
 0x7fc   :  { %1581 = vst.msk [vmem:[#allocation17] sm:$0xff] %vm234_vm0, %v1579_v45 }
 0x7fd   :  { %v1568_v28 = vsel %vm1567_vm3, %v1803_v12, %v1564_v15 }
 0x7fe   :  { %v1570_v31 = vmul.f32 %v1568_v28, %v1536_v14 }
 0x800   :  { %v1575_v11 = vmul.f32 %v1716_v32, %v1570_v31 }
 0x802   :  { %v1580_v53 = vadd.f32 %v1717_v4, %v1575_v11 }
 0x804   :  { %1582 = vst.msk [vmem:[#allocation17 + $0x8] sm:$0xff] %vm234_vm0, %v1580_v53 }
 0x805   :  { %1595 = dma.vmem_to_hbm [thread:$0]  %s1588_s16, 256, %s1590_s28, [#allocation4], %s2062_s27, %s2062_s27, %s2063_s7  }
 0x806   :  { %2056 = dma.done.wait [#allocation4], 256  }
 0x807   :  { %2057 = vsyncadd [#allocation4], 4294967040 }
 0x808   :  { %1600 = vsyncpa [#allocation3], 1 }
 0x809   :  { %1601 = vsyncpa [#allocation6], 1 }
 0x80a   :  { %1602 = vsyncpa [#allocation9], 1 }
 0x80b   :  { %1603 = vsyncpa [#allocation12], 1 }
 0x80c   :  { %1604 = vsyncpa [#allocation15], 1 }
 0x80d   :  { %1605 = vsyncpa [#allocation4], 1 }

</bundles_post_ra>
